<compile_context>
chip_gen: v7x
topology: tpu7x:2x2x1
jax: 0.10.0
libtpu: 0.0.40
codegen_flags: <defaults>
</compile_context>

<pallas_src>
import functools

import jax
import jax.numpy as jnp
from jax import lax
from jax.experimental import pallas as pl
from jax.experimental.pallas import tpu as pltpu


# ----------------------------------------------------------------------------
# Pallas kernels
# ----------------------------------------------------------------------------
def _conv3x3_bn_kernel(x_ref, w_ref, s_ref, b_ref, o_ref, *, th, wo, dil, relu):
    """3x3 conv (stride=1, dilation=dil) + folded BN (+ optional ReLU).

    x_ref: (1, th + 2*dil, wo + 2*dil, Cin)  bf16 halo row-tile
    w_ref: (3, 3, Cin, tn)                   bf16 conv weights (HWIO)
    s_ref, b_ref: (1, tn)                    f32 folded BN scale / bias
    o_ref: (1, th*wo, tn)
    """
    cin = x_ref.shape[-1]
    tn = o_ref.shape[-1]
    xtile = x_ref[0]  # (th+2d, wo+2d, Cin) bf16, loaded once

    acc = jnp.zeros((th * wo, tn), jnp.float32)
    for ky in range(3):
        for kx in range(3):
            win = xtile[ky * dil:ky * dil + th, kx * dil:kx * dil + wo, :]
            a = win.reshape(th * wo, cin)                       # bf16
            acc = acc + jnp.dot(a, w_ref[ky, kx],
                                preferred_element_type=jnp.float32)
    acc = acc * s_ref[...] + b_ref[...]
    if relu:
        acc = jnp.maximum(acc, 0.0)
    o_ref[0] = acc.astype(o_ref.dtype)


def _conv3x3_bn_ds_res_kernel(x_ref, xds_ref, w_ref, wds_ref,
                              s_ref, b_ref, sds_ref, bds_ref, o_ref,
                              *, th, wo, dil):
    """3x3 conv + BN2, fused 1x1 downsample conv + BN_ds, residual add, ReLU.

    x_ref:   (1, th + 2*dil, wo + 2*dil, Cmid) bf16 halo tile of conv1 output
    xds_ref: (1, th*wo, Cin)                   bf16 original input (stride-1)
    w_ref:   (3, 3, Cmid, tn) bf16, wds_ref: (Cin, tn) bf16
    s/b/sds/bds: (1, tn) f32, o_ref: (1, th*wo, tn) f32
    """
    cmid = x_ref.shape[-1]
    tn = o_ref.shape[-1]
    xtile = x_ref[0]

    acc = jnp.zeros((th * wo, tn), jnp.float32)
    for ky in range(3):
        for kx in range(3):
            win = xtile[ky * dil:ky * dil + th, kx * dil:kx * dil + wo, :]
            a = win.reshape(th * wo, cmid)
            acc = acc + jnp.dot(a, w_ref[ky, kx],
                                preferred_element_type=jnp.float32)
    acc = acc * s_ref[...] + b_ref[...]

    # fused 1x1-conv downsample residual (tiny matmul, hides under the 3x3 work)
    res = jnp.dot(xds_ref[0], wds_ref[...], preferred_element_type=jnp.float32)
    res = res * sds_ref[...] + bds_ref[...]

    o_ref[0] = jnp.maximum(acc + res, 0.0).astype(o_ref.dtype)


# ----------------------------------------------------------------------------
# Wrappers
# ----------------------------------------------------------------------------
def _pick_row_tile(ho, max_rows=32):
    for th in range(min(ho, max_rows), 0, -1):
        if ho % th == 0:
            return th
    return ho


def _build_halo_tiles(x_nhwc, th, dil):
    """(N, H, W, C) -> (N*T, th + 2*dil, W + 2*dil, C) overlapping row tiles."""
    n, h, w, c = x_nhwc.shape
    xp = jnp.pad(x_nhwc, ((0, 0), (dil, dil), (dil, dil), (0, 0)))
    t = h // th
    tiles = [xp[:, i * th:i * th + th + 2 * dil] for i in range(t)]
    xt = jnp.stack(tiles, axis=1)  # (N, T, th+2d, W+2d, C)
    return xt.reshape(n * t, th + 2 * dil, w + 2 * dil, c)


def _compiler_params():
    return pltpu.CompilerParams(
        dimension_semantics=("parallel", "parallel"),
        vmem_limit_bytes=32 * 1024 * 1024,
    )


def conv3x3_bn_act(x_nhwc, w_hwio, scale, bias, *, dil=1, relu=True,
                   out_dtype=jnp.bfloat16):
    """y = act(bn(conv3x3_stride1(x))) as one fused Pallas call. Returns NHWC."""
    n, h, w, cin = x_nhwc.shape
    cout = w_hwio.shape[-1]
    ho, wo = h, w
    th = _pick_row_tile(ho)
    t = ho // th
    g = n * t
    tn = 128 if (cout % 128 == 0) else cout

    xt = _build_halo_tiles(x_nhwc.astype(jnp.bfloat16), th, dil)
    wmat = w_hwio.astype(jnp.bfloat16)
    s2d = scale.reshape(1, cout).astype(jnp.float32)
    b2d = bias.reshape(1, cout).astype(jnp.float32)

    out = pl.pallas_call(
        functools.partial(_conv3x3_bn_kernel, th=th, wo=wo, dil=dil, relu=relu),
        out_shape=jax.ShapeDtypeStruct((g, th * wo, cout), out_dtype),
        grid_spec=pltpu.PrefetchScalarGridSpec(
            num_scalar_prefetch=0,
            grid=(g, cout // tn),
            in_specs=[
                pl.BlockSpec((1, th + 2 * dil, wo + 2 * dil, cin),
                             lambda i, j: (i, 0, 0, 0)),
                pl.BlockSpec((3, 3, cin, tn), lambda i, j: (0, 0, 0, j)),
                pl.BlockSpec((1, tn), lambda i, j: (0, j)),
                pl.BlockSpec((1, tn), lambda i, j: (0, j)),
            ],
            out_specs=pl.BlockSpec((1, th * wo, tn), lambda i, j: (i, 0, j)),
        ),
        compiler_params=_compiler_params(),
    )(xt, wmat, s2d, b2d)
    return out.reshape(n, ho, wo, cout)


def conv3x3_bn_ds_residual(y_nhwc, x_nhwc, w2_hwio, wds_io, s2, b2, sds, bds,
                           *, dil=1, out_dtype=jnp.float32):
    """out = relu(bn2(conv3x3(y)) + bn_ds(conv1x1(x))), fully fused. NHWC."""
    n, h, w, cmid = y_nhwc.shape
    cin = x_nhwc.shape[-1]
    cout = w2_hwio.shape[-1]
    ho, wo = h, w
    th = _pick_row_tile(ho)
    t = ho // th
    g = n * t
    tn = 128 if (cout % 128 == 0) else cout

    yt = _build_halo_tiles(y_nhwc.astype(jnp.bfloat16), th, dil)
    xds = x_nhwc.astype(jnp.bfloat16).reshape(g, th * wo, cin)
    w2 = w2_hwio.astype(jnp.bfloat16)
    wds = wds_io.astype(jnp.bfloat16)
    s2d = s2.reshape(1, cout).astype(jnp.float32)
    b2d = b2.reshape(1, cout).astype(jnp.float32)
    sds2d = sds.reshape(1, cout).astype(jnp.float32)
    bds2d = bds.reshape(1, cout).astype(jnp.float32)

    out = pl.pallas_call(
        functools.partial(_conv3x3_bn_ds_res_kernel, th=th, wo=wo, dil=dil),
        out_shape=jax.ShapeDtypeStruct((g, th * wo, cout), out_dtype),
        grid_spec=pltpu.PrefetchScalarGridSpec(
            num_scalar_prefetch=0,
            grid=(g, cout // tn),
            in_specs=[
                pl.BlockSpec((1, th + 2 * dil, wo + 2 * dil, cmid),
                             lambda i, j: (i, 0, 0, 0)),
                pl.BlockSpec((1, th * wo, cin), lambda i, j: (i, 0, 0)),
                pl.BlockSpec((3, 3, cmid, tn), lambda i, j: (0, 0, 0, j)),
                pl.BlockSpec((cin, tn), lambda i, j: (0, j)),
                pl.BlockSpec((1, tn), lambda i, j: (0, j)),
                pl.BlockSpec((1, tn), lambda i, j: (0, j)),
                pl.BlockSpec((1, tn), lambda i, j: (0, j)),
                pl.BlockSpec((1, tn), lambda i, j: (0, j)),
            ],
            out_specs=pl.BlockSpec((1, th * wo, tn), lambda i, j: (i, 0, j)),
        ),
        compiler_params=_compiler_params(),
    )(yt, xds, w2, wds, s2d, b2d, sds2d, bds2d)
    return out.reshape(n, ho, wo, cout)


def fold_bn(gamma, beta, mean, var, eps=1e-5):
    scale = gamma / jnp.sqrt(var + eps)
    bias = beta - mean * scale
    return scale, bias


def basic_block_with_down(x_nchw, params, stride=1, dilation=1):
    """Forward of BasicBlockwithDown (residual=None path). NCHW in / NCHW out."""
    if stride != 1:
        # TODO(synk): stride>1 path needs strided in-kernel window reads; not
        # needed for this configuration (default stride=1).
        raise NotImplementedError("Pallas path implements stride=1 only")

    x = jnp.transpose(x_nchw, (0, 2, 3, 1))  # NHWC

    w1 = jnp.transpose(params["w1"], (2, 3, 1, 0))   # OIHW -> HWIO
    w2 = jnp.transpose(params["w2"], (2, 3, 1, 0))
    wds = params["w_ds"][:, :, 0, 0].T               # (Cin, Cout)
    s1, b1 = fold_bn(*params["bn1"])
    s2, b2 = fold_bn(*params["bn2"])
    sds, bds = fold_bn(*params["bn_ds"])

    # conv1 + BN1 + ReLU  (intermediate kept in bf16 to halve HBM traffic)
    y1 = conv3x3_bn_act(x, w1, s1, b1, dil=dilation, relu=True,
                        out_dtype=jnp.bfloat16)
    # conv2 + BN2 + fused 1x1-downsample residual + ReLU
    out = conv3x3_bn_ds_residual(y1, x, w2, wds, s2, b2, sds, bds,
                                 dil=dilation, out_dtype=jnp.float32)
    return jnp.transpose(out, (0, 3, 1, 2))  # NCHW


# ----------------------------------------------------------------------------
# Pure-JAX reference (lax conv, same bf16 matmul-operand rounding) for checking
# ----------------------------------------------------------------------------
def reference_forward(x_nchw, params, stride=1, dilation=1):
    dn = lax.conv_dimension_numbers(x_nchw.shape, params["w1"].shape,
                                    ("NCHW", "OIHW", "NCHW"))

    def conv(x, wgt, s, d, pad):
        return lax.conv_general_dilated(
            x.astype(jnp.bfloat16), wgt.astype(jnp.bfloat16), (s, s),
            [(pad, pad), (pad, pad)], rhs_dilation=(d, d),
            dimension_numbers=dn, preferred_element_type=jnp.float32)

    def bn(x, p):
        gamma, beta, mean, var = p
        scale, bias = fold_bn(gamma, beta, mean, var)
        return x * scale[None, :, None, None] + bias[None, :, None, None]

    residual = bn(conv(x_nchw, params["w_ds"], stride, 1, 0), params["bn_ds"])
    out = jnp.maximum(bn(conv(x_nchw, params["w1"], stride, dilation, dilation),
                         params["bn1"]), 0.0)
    out = out.astype(jnp.bfloat16).astype(jnp.float32)  # kernel stores bf16
    out = bn(conv(out, params["w2"], 1, dilation, dilation), params["bn2"])
    return jnp.maximum(out + residual, 0.0)


# ----------------------------------------------------------------------------
def init_params(key, inplanes, planes):
    ks = jax.random.split(key, 8)

    def bn_params(k):
        k1, k2, k3, k4 = jax.random.split(k, 4)
        gamma = 1.0 + 0.1 * jax.random.normal(k1, (planes,), jnp.float32)
        beta = 0.1 * jax.random.normal(k2, (planes,), jnp.float32)
        mean = 0.05 * jax.random.normal(k3, (planes,), jnp.float32)
        var = 0.5 + 0.5 * jax.random.uniform(k4, (planes,), jnp.float32)
        return (gamma, beta, mean, var)

    return {
        "w1": 0.1 * jax.random.normal(ks[0], (planes, inplanes, 3, 3), jnp.float32),
        "w2": 0.1 * jax.random.normal(ks[1], (planes, planes, 3, 3), jnp.float32),
        "w_ds": 0.1 * jax.random.normal(ks[2], (planes, inplanes, 1, 1), jnp.float32),
        "bn1": bn_params(ks[3]),
        "bn2": bn_params(ks[4]),
        "bn_ds": bn_params(ks[5]),
    }


if __name__ == "__main__":
    key = jax.random.PRNGKey(0)
    kx, kp = jax.random.split(key)

    N, Cin, H, W = 2, 4, 16, 16
    planes = 8
    stride, dilation = 1, 1

    x = jax.random.normal(kx, (N, Cin, H, W), jnp.float32)
    params = init_params(kp, Cin, planes)

    out = basic_block_with_down(x, params, stride=stride, dilation=dilation)
    out = jax.block_until_ready(out)

    ref = reference_forward(x, params, stride=stride, dilation=dilation)
    assert out.shape == ref.shape == (N, planes, H, W)
    # bf16 matmul operands with f32 accumulation in both paths -> tight match.
    assert jnp.allclose(out, ref, atol=2e-2, rtol=2e-2), "mismatch vs reference"

    print("KERNEL_OK")
</pallas_src>

<mosaic_0001>
module attributes {stable_mosaic.version = 11 : i64} {
  func.func @_conv3x3_bn_kernel(%arg0: i32, %arg1: i32, %arg2: memref<1x18x18x4xbf16, #tpu.memory_space<vmem>>, %arg3: memref<3x3x4x8xbf16, #tpu.memory_space<vmem>>, %arg4: memref<1x8xf32, #tpu.memory_space<vmem>>, %arg5: memref<1x8xf32, #tpu.memory_space<vmem>>, %arg6: memref<1x256x8xbf16, #tpu.memory_space<vmem>>) attributes {dimension_semantics = [#tpu.dimension_semantics<parallel>, #tpu.dimension_semantics<parallel>], iteration_bounds = array<i64: 2, 1>, scalar_prefetch = 0 : i64, scratch_operands = 0 : i64, tpu.core_type = #tpu.core_type<tc>, window_params = [{transform_indices = @transform_0, window_bounds = array<i64: 1, 18, 18, 4>}, {transform_indices = @transform_1, window_bounds = array<i64: 3, 3, 4, 8>}, {transform_indices = @transform_2, window_bounds = array<i64: 1, 8>}, {transform_indices = @transform_3, window_bounds = array<i64: 1, 8>}, {transform_indices = @transform_4, window_bounds = array<i64: 1, 256, 8>}]} {
    %c0 = arith.constant 0 : index
    %c0_0 = arith.constant 0 : index
    %c0_1 = arith.constant 0 : index
    %c0_2 = arith.constant 0 : index
    %0 = vector.load %arg2[%c0, %c0_0, %c0_1, %c0_2] : memref<1x18x18x4xbf16, #tpu.memory_space<vmem>>, vector<1x18x18x4xbf16>
    %1 = vector.shape_cast %0 : vector<1x18x18x4xbf16> to vector<18x18x4xbf16>
    %cst = arith.constant 0.000000e+00 : f32
    %2 = vector.broadcast %cst : f32 to vector<256x8xf32>
    %3 = vector.extract_strided_slice %1 {offsets = [0, 0, 0], sizes = [16, 16, 4], strides = [1, 1, 1]} : vector<18x18x4xbf16> to vector<16x16x4xbf16>
    %4 = vector.shape_cast %3 : vector<16x16x4xbf16> to vector<256x4xbf16>
    %c0_3 = arith.constant 0 : index
    %c0_4 = arith.constant 0 : index
    %c0_5 = arith.constant 0 : index
    %c0_6 = arith.constant 0 : index
    %5 = vector.load %arg3[%c0_3, %c0_4, %c0_5, %c0_6] : memref<3x3x4x8xbf16, #tpu.memory_space<vmem>>, vector<1x1x4x8xbf16>
    %6 = vector.shape_cast %5 : vector<1x1x4x8xbf16> to vector<4x8xbf16>
    %cst_7 = arith.constant dense<0.000000e+00> : vector<256x8xf32>
    %7 = tpu.matmul %4, %6, %cst_7 {dimension_numbers = #tpu.dot_dimension_numbers<[1], [0], [0], [1], [0, 0, 1, 1], [], []>} : vector<256x4xbf16>, vector<4x8xbf16>, vector<256x8xf32> -> vector<256x8xf32>
    %8 = arith.addf %2, %7 : vector<256x8xf32>
    %9 = vector.extract_strided_slice %1 {offsets = [0, 1, 0], sizes = [16, 16, 4], strides = [1, 1, 1]} : vector<18x18x4xbf16> to vector<16x16x4xbf16>
    %10 = vector.shape_cast %9 : vector<16x16x4xbf16> to vector<256x4xbf16>
    %c0_8 = arith.constant 0 : index
    %c1 = arith.constant 1 : index
    %c0_9 = arith.constant 0 : index
    %c0_10 = arith.constant 0 : index
    %11 = vector.load %arg3[%c0_8, %c1, %c0_9, %c0_10] : memref<3x3x4x8xbf16, #tpu.memory_space<vmem>>, vector<1x1x4x8xbf16>
    %12 = vector.shape_cast %11 : vector<1x1x4x8xbf16> to vector<4x8xbf16>
    %cst_11 = arith.constant dense<0.000000e+00> : vector<256x8xf32>
    %13 = tpu.matmul %10, %12, %cst_11 {dimension_numbers = #tpu.dot_dimension_numbers<[1], [0], [0], [1], [0, 0, 1, 1], [], []>} : vector<256x4xbf16>, vector<4x8xbf16>, vector<256x8xf32> -> vector<256x8xf32>
    %14 = arith.addf %8, %13 : vector<256x8xf32>
    %15 = vector.extract_strided_slice %1 {offsets = [0, 2, 0], sizes = [16, 16, 4], strides = [1, 1, 1]} : vector<18x18x4xbf16> to vector<16x16x4xbf16>
    %16 = vector.shape_cast %15 : vector<16x16x4xbf16> to vector<256x4xbf16>
    %c0_12 = arith.constant 0 : index
    %c2 = arith.constant 2 : index
    %c0_13 = arith.constant 0 : index
    %c0_14 = arith.constant 0 : index
    %17 = vector.load %arg3[%c0_12, %c2, %c0_13, %c0_14] : memref<3x3x4x8xbf16, #tpu.memory_space<vmem>>, vector<1x1x4x8xbf16>
    %18 = vector.shape_cast %17 : vector<1x1x4x8xbf16> to vector<4x8xbf16>
    %cst_15 = arith.constant dense<0.000000e+00> : vector<256x8xf32>
    %19 = tpu.matmul %16, %18, %cst_15 {dimension_numbers = #tpu.dot_dimension_numbers<[1], [0], [0], [1], [0, 0, 1, 1], [], []>} : vector<256x4xbf16>, vector<4x8xbf16>, vector<256x8xf32> -> vector<256x8xf32>
    %20 = arith.addf %14, %19 : vector<256x8xf32>
    %21 = vector.extract_strided_slice %1 {offsets = [1, 0, 0], sizes = [16, 16, 4], strides = [1, 1, 1]} : vector<18x18x4xbf16> to vector<16x16x4xbf16>
    %22 = vector.shape_cast %21 : vector<16x16x4xbf16> to vector<256x4xbf16>
    %c1_16 = arith.constant 1 : index
    %c0_17 = arith.constant 0 : index
    %c0_18 = arith.constant 0 : index
    %c0_19 = arith.constant 0 : index
    %23 = vector.load %arg3[%c1_16, %c0_17, %c0_18, %c0_19] : memref<3x3x4x8xbf16, #tpu.memory_space<vmem>>, vector<1x1x4x8xbf16>
    %24 = vector.shape_cast %23 : vector<1x1x4x8xbf16> to vector<4x8xbf16>
    %cst_20 = arith.constant dense<0.000000e+00> : vector<256x8xf32>
    %25 = tpu.matmul %22, %24, %cst_20 {dimension_numbers = #tpu.dot_dimension_numbers<[1], [0], [0], [1], [0, 0, 1, 1], [], []>} : vector<256x4xbf16>, vector<4x8xbf16>, vector<256x8xf32> -> vector<256x8xf32>
    %26 = arith.addf %20, %25 : vector<256x8xf32>
    %27 = vector.extract_strided_slice %1 {offsets = [1, 1, 0], sizes = [16, 16, 4], strides = [1, 1, 1]} : vector<18x18x4xbf16> to vector<16x16x4xbf16>
    %28 = vector.shape_cast %27 : vector<16x16x4xbf16> to vector<256x4xbf16>
    %c1_21 = arith.constant 1 : index
    %c1_22 = arith.constant 1 : index
    %c0_23 = arith.constant 0 : index
    %c0_24 = arith.constant 0 : index
    %29 = vector.load %arg3[%c1_21, %c1_22, %c0_23, %c0_24] : memref<3x3x4x8xbf16, #tpu.memory_space<vmem>>, vector<1x1x4x8xbf16>
    %30 = vector.shape_cast %29 : vector<1x1x4x8xbf16> to vector<4x8xbf16>
    %cst_25 = arith.constant dense<0.000000e+00> : vector<256x8xf32>
    %31 = tpu.matmul %28, %30, %cst_25 {dimension_numbers = #tpu.dot_dimension_numbers<[1], [0], [0], [1], [0, 0, 1, 1], [], []>} : vector<256x4xbf16>, vector<4x8xbf16>, vector<256x8xf32> -> vector<256x8xf32>
    %32 = arith.addf %26, %31 : vector<256x8xf32>
    %33 = vector.extract_strided_slice %1 {offsets = [1, 2, 0], sizes = [16, 16, 4], strides = [1, 1, 1]} : vector<18x18x4xbf16> to vector<16x16x4xbf16>
    %34 = vector.shape_cast %33 : vector<16x16x4xbf16> to vector<256x4xbf16>
    %c1_26 = arith.constant 1 : index
    %c2_27 = arith.constant 2 : index
    %c0_28 = arith.constant 0 : index
    %c0_29 = arith.constant 0 : index
    %35 = vector.load %arg3[%c1_26, %c2_27, %c0_28, %c0_29] : memref<3x3x4x8xbf16, #tpu.memory_space<vmem>>, vector<1x1x4x8xbf16>
    %36 = vector.shape_cast %35 : vector<1x1x4x8xbf16> to vector<4x8xbf16>
    %cst_30 = arith.constant dense<0.000000e+00> : vector<256x8xf32>
    %37 = tpu.matmul %34, %36, %cst_30 {dimension_numbers = #tpu.dot_dimension_numbers<[1], [0], [0], [1], [0, 0, 1, 1], [], []>} : vector<256x4xbf16>, vector<4x8xbf16>, vector<256x8xf32> -> vector<256x8xf32>
    %38 = arith.addf %32, %37 : vector<256x8xf32>
    %39 = vector.extract_strided_slice %1 {offsets = [2, 0, 0], sizes = [16, 16, 4], strides = [1, 1, 1]} : vector<18x18x4xbf16> to vector<16x16x4xbf16>
    %40 = vector.shape_cast %39 : vector<16x16x4xbf16> to vector<256x4xbf16>
    %c2_31 = arith.constant 2 : index
    %c0_32 = arith.constant 0 : index
    %c0_33 = arith.constant 0 : index
    %c0_34 = arith.constant 0 : index
    %41 = vector.load %arg3[%c2_31, %c0_32, %c0_33, %c0_34] : memref<3x3x4x8xbf16, #tpu.memory_space<vmem>>, vector<1x1x4x8xbf16>
    %42 = vector.shape_cast %41 : vector<1x1x4x8xbf16> to vector<4x8xbf16>
    %cst_35 = arith.constant dense<0.000000e+00> : vector<256x8xf32>
    %43 = tpu.matmul %40, %42, %cst_35 {dimension_numbers = #tpu.dot_dimension_numbers<[1], [0], [0], [1], [0, 0, 1, 1], [], []>} : vector<256x4xbf16>, vector<4x8xbf16>, vector<256x8xf32> -> vector<256x8xf32>
    %44 = arith.addf %38, %43 : vector<256x8xf32>
    %45 = vector.extract_strided_slice %1 {offsets = [2, 1, 0], sizes = [16, 16, 4], strides = [1, 1, 1]} : vector<18x18x4xbf16> to vector<16x16x4xbf16>
    %46 = vector.shape_cast %45 : vector<16x16x4xbf16> to vector<256x4xbf16>
    %c2_36 = arith.constant 2 : index
    %c1_37 = arith.constant 1 : index
    %c0_38 = arith.constant 0 : index
    %c0_39 = arith.constant 0 : index
    %47 = vector.load %arg3[%c2_36, %c1_37, %c0_38, %c0_39] : memref<3x3x4x8xbf16, #tpu.memory_space<vmem>>, vector<1x1x4x8xbf16>
    %48 = vector.shape_cast %47 : vector<1x1x4x8xbf16> to vector<4x8xbf16>
    %cst_40 = arith.constant dense<0.000000e+00> : vector<256x8xf32>
    %49 = tpu.matmul %46, %48, %cst_40 {dimension_numbers = #tpu.dot_dimension_numbers<[1], [0], [0], [1], [0, 0, 1, 1], [], []>} : vector<256x4xbf16>, vector<4x8xbf16>, vector<256x8xf32> -> vector<256x8xf32>
    %50 = arith.addf %44, %49 : vector<256x8xf32>
    %51 = vector.extract_strided_slice %1 {offsets = [2, 2, 0], sizes = [16, 16, 4], strides = [1, 1, 1]} : vector<18x18x4xbf16> to vector<16x16x4xbf16>
    %52 = vector.shape_cast %51 : vector<16x16x4xbf16> to vector<256x4xbf16>
    %c2_41 = arith.constant 2 : index
    %c2_42 = arith.constant 2 : index
    %c0_43 = arith.constant 0 : index
    %c0_44 = arith.constant 0 : index
    %53 = vector.load %arg3[%c2_41, %c2_42, %c0_43, %c0_44] : memref<3x3x4x8xbf16, #tpu.memory_space<vmem>>, vector<1x1x4x8xbf16>
    %54 = vector.shape_cast %53 : vector<1x1x4x8xbf16> to vector<4x8xbf16>
    %cst_45 = arith.constant dense<0.000000e+00> : vector<256x8xf32>
    %55 = tpu.matmul %52, %54, %cst_45 {dimension_numbers = #tpu.dot_dimension_numbers<[1], [0], [0], [1], [0, 0, 1, 1], [], []>} : vector<256x4xbf16>, vector<4x8xbf16>, vector<256x8xf32> -> vector<256x8xf32>
    %56 = arith.addf %50, %55 : vector<256x8xf32>
    %c0_46 = arith.constant 0 : index
    %c0_47 = arith.constant 0 : index
    %57 = vector.load %arg4[%c0_46, %c0_47] : memref<1x8xf32, #tpu.memory_space<vmem>>, vector<1x8xf32>
    %58 = vector.broadcast %57 : vector<1x8xf32> to vector<256x8xf32>
    %59 = arith.mulf %56, %58 : vector<256x8xf32>
    %c0_48 = arith.constant 0 : index
    %c0_49 = arith.constant 0 : index
    %60 = vector.load %arg5[%c0_48, %c0_49] : memref<1x8xf32, #tpu.memory_space<vmem>>, vector<1x8xf32>
    %61 = vector.broadcast %60 : vector<1x8xf32> to vector<256x8xf32>
    %62 = arith.addf %59, %61 : vector<256x8xf32>
    %cst_50 = arith.constant 0.000000e+00 : f32
    %63 = vector.broadcast %cst_50 : f32 to vector<256x8xf32>
    %64 = arith.maximumf %62, %63 : vector<256x8xf32>
    %65 = arith.truncf %64 : vector<256x8xf32> to vector<256x8xbf16>
    %c0_51 = arith.constant 0 : index
    %c0_52 = arith.constant 0 : index
    %c0_53 = arith.constant 0 : index
    %66 = vector.load %arg6[%c0_51, %c0_52, %c0_53] : memref<1x256x8xbf16, #tpu.memory_space<vmem>>, vector<1x256x8xbf16>
    %67 = vector.shape_cast %66 : vector<1x256x8xbf16> to vector<256x8xbf16>
    %68 = vector.shape_cast %65 : vector<256x8xbf16> to vector<1x256x8xbf16>
    tpu.vector_store %arg6[%c0_51, %c0_52, %c0_53], %68 {strides = array<i32>} : memref<1x256x8xbf16, #tpu.memory_space<vmem>>, vector<1x256x8xbf16>,
    return
  }
  func.func @transform_0(%arg0: i32, %arg1: i32) -> (i32, i32, i32, i32) {
    %c0_i32 = arith.constant 0 : i32
    %c0_i32_0 = arith.constant 0 : i32
    %c0_i32_1 = arith.constant 0 : i32
    %c0_i32_2 = arith.constant 0 : i32
    return %arg0, %c0_i32, %c0_i32_0, %c0_i32_1 : i32, i32, i32, i32
  }
  func.func @transform_1(%arg0: i32, %arg1: i32) -> (i32, i32, i32, i32) {
    %c0_i32 = arith.constant 0 : i32
    %c0_i32_0 = arith.constant 0 : i32
    %c0_i32_1 = arith.constant 0 : i32
    %c0_i32_2 = arith.constant 0 : i32
    return %c0_i32, %c0_i32_0, %c0_i32_1, %arg1 : i32, i32, i32, i32
  }
  func.func @transform_2(%arg0: i32, %arg1: i32) -> (i32, i32) {
    %c0_i32 = arith.constant 0 : i32
    %c0_i32_0 = arith.constant 0 : i32
    return %c0_i32, %arg1 : i32, i32
  }
  func.func @transform_3(%arg0: i32, %arg1: i32) -> (i32, i32) {
    %c0_i32 = arith.constant 0 : i32
    %c0_i32_0 = arith.constant 0 : i32
    return %c0_i32, %arg1 : i32, i32
  }
  func.func @transform_4(%arg0: i32, %arg1: i32) -> (i32, i32, i32) {
    %c0_i32 = arith.constant 0 : i32
    %c0_i32_0 = arith.constant 0 : i32
    return %arg0, %c0_i32, %arg1 : i32, i32, i32
  }
}

</mosaic_0001>

<bundles_post_ra>
// kernel: tpu_custom_call.1
= control target key start
LH: loop header
LB: loop body
LE: loop exit
PB: predicated region body
PF: predicated region fallthrough
CT: control target
= control target key end

     0   :  { %s4494_s15 = smov 0   ;;  %s4496_s16 = smov 0   ;;  %s5641_s0 = inlined_call_operand.vmem [shape: bf16[2,18,18,4], index: 0, kind: input, shape index: {}]   ;;  %s5642_s1 = inlined_call_operand.vmem [shape: bf16[3,3,4,8], index: 1, kind: input, shape index: {}]   ;;  %s5643_s2 = inlined_call_operand.vmem [shape: f32[1,8], index: 2, kind: input, shape index: {}]   ;;  %s5644_s3 = inlined_call_operand.vmem [shape: f32[1,8], index: 3, kind: input, shape index: {}]   ;;  %s5645_s4 = inlined_call_operand.vmem [shape: bf16[2,256,8], index: 4, kind: output, shape index: {}]  }
   0x1   :  { %s4498_s17 = smov 0  }
   0x2 LB: > { %s26_s18 = sadd.s32 1, %s4463_s16  ;;  %p3374_p0 = scmp.ge.s32.totalorder %s4467_s17, 1  ;;  %s4467_s17 = sphi %s4498_s17, %s14_s17   ;;  %s4463_s16 = sphi %s4496_s16, %s5724_s16   ;;  %s4459_s15 = sphi %s4494_s15, %s5723_s15  }
   0x3   : > { %p28_p1 = scmp.ge.s32.totalorder %s26_s18, 2  ;;  %p201_p2 = scmp.lt.s32.totalorder %s4467_s17, 3 }
   0x5   : > { %s5726_s18 = smov (%p28_p1, %s26_s18), 0  ;;  %p202_p3 = pnand %p3374_p0, %p201_p2 }
   0x7   : > { %205 = sbr.rel (%p202_p3) target bundleno = 558 (0x22e), region = 36 }
   0xe   : > { %v3378_v0 = vld [vmem:[%s5642_s1 + $0x2] sm:$0x3]  ;;  %vm805_vm0 = vcmask 1041408   ;;  %v3510_v1 = vld [vmem:[%s5642_s1 + $0x8] sm:$0x3]  ;;  %p240_p4 = scmp.lt.s32.totalorder %s4459_s15, 1 }
   0xf   : > { %4388 = vmatprep.subr.msk.bf16.mxu1 %vm805_vm0, %v3378_v0  ;;  %4392 = vmatprep.subr.msk.bf16.mxu0 %vm805_vm0, %v3510_v1  ;;  %v807_v2 = vsel %vm805_vm0, %v3378_v0, 0  ;;  %v4522_v3 = vsel %vm805_vm0, %v3510_v1, 0  ;;  %v318_v4 = vld [vmem:[%s5642_s1] sm:$0x3]  ;;  %v3529_v5 = vld [vmem:[%s5642_s1 + $0xa] sm:$0x3] }
  0x10   : > { %5677 = vst [vmem:[#allocation2_spill] sm:$0xff] %v4522_v3  ;;  %3825 = vmatpush3.bf16.msra.mxu1 %v807_v2  ;;  %3961 = vmatpush3.bf16.msra.mxu0 %v4522_v3  ;;  %s5728_s15 = smov (!%p240_p4, %s4459_s15), 1  ;;  %vm319_vm1 = vsmask.f32 3328  ;;  %vm320_vm2 = vsmask.f32 7440 }
  0x11   : > { %4389 = vmatprep.subr.msk.bf16.mxu1 %vm805_vm0, %v318_v4  ;;  %4394 = vmatprep.subr.msk.bf16.mxu0 %vm805_vm0, %v3529_v5  ;;  %s4398_s27 = smul.u32 216, %s5728_s15  ;;  %v4542_v6 = vsel %vm805_vm0, %v318_v4, 0  ;;  %v4545_v7 = vsel %vm805_vm0, %v3529_v5, 0  ;;  %v4550_v8 = vld [vmem:[%s5642_s1 + $0xc] sm:$0x3]  ;;  %vm756_vm3 = vcmask 31744   ;;  %vm4586_vm4 = vmor %vm319_vm1, %vm320_vm2 }
  0x12   : > { %v4574_v20 = vsel %vm805_vm0, %v4550_v8, 0  ;;  %vm1278_vm5 = vcmask 1042432   ;;  %vm1279_vm6 = vcmask 1046532   ;;  %s3638_s25 = sshll.u32 %s5728_s15, 7  ;;  %vm3217_vm8 = vcmask 60416  }
  0x13   : > { %s4539_s30 = scalar_lea.vmem %s5641_s0, %s4398_s27  ;;  %vm4767_vm7 = vmor %vm1278_vm5, %vm1279_vm6  ;;  %s5502_s28 = scalar_lea.vmem %s5645_s4, %s3638_s25 }
  0x14   : > { %v4553_v9 = vld [vmem:[%s4539_s30] sm:$0xf]  ;;  %v4556_v10 = vld [vmem:[%s4539_s30 + $0x4] sm:$0xf]  ;;  %v266_v11 = vld [vmem:[%s4539_s30 + $0x8] sm:$0x1] }
  0x15   : > { %v323_v12 = vshrl.u32 %v4553_v9, 16  ;;  %v326_v13 = vshll.u32 %v4553_v9, 16  ;;  %v332_v14 = vshll.u32 %v4556_v10, 16  ;;  %v336_v15 = vshrl.u32 %v4556_v10, 16  ;;  %v4564_v16 = vld [vmem:[%s4539_s30 + $0xc] sm:$0xf] }
  0x16   : > { %v342_v17 = vshll.u32 %v266_v11, 16  ;;  %v4567_v18 = vld [vmem:[%s4539_s30 + $0x10] sm:$0xf]  ;;  %v4570_v19 = vld [vmem:[%s4539_s30 + $0x14] sm:$0x1]  ;;  %v347_v26 = vshrl.u32 %v4564_v16, 16 }
  0x17   : > { %v325_v21 = vrot.slane %v323_v12, 4  ;;  %v328_v22 = vrot.slane %v326_v13, 5  ;;  %v334_v23 = vrot.slane %v332_v14, 5  ;;  %v338_v24 = vrot.slane %v336_v15, 4  ;;  %v4582_v33 = vld [vmem:[%s4539_s30 + $0x18] sm:$0xf] }
  0x18   : > { %v344_v25 = vrot.slane %v342_v17, 5  ;;  %v350_v27 = vshll.u32 %v4564_v16, 16  ;;  %v356_v28 = vshll.u32 %v4567_v18, 16  ;;  %v360_v31 = vshrl.u32 %v4567_v18, 16  ;;  %v4595_v39 = vld [vmem:[%s4539_s30 + $0x1c] sm:$0xf] }
  0x19   : > { %v329_v29 = vor.u32 %v328_v22, %v325_v21  ;;  %v339_v30 = vor.u32 %v338_v24, %v334_v23  ;;  %v366_v32 = vshll.u32 %v4570_v19, 16  ;;  %v349_v35 = vrot.slane %v347_v26, 4  ;;  %v4599_v46 = vld [vmem:[%s4539_s30 + $0x20] sm:$0x1]  ;;  %v4609_v57 = vld [vmem:[%s4539_s30 + $0x24] sm:$0xf] }
  0x1a   : > { %v352_v36 = vrot.slane %v350_v27, 5  ;;  %v358_v37 = vrot.slane %v356_v28, 5  ;;  %v4592_v38 = vcombine.low %v4564_v16, %v4567_v18  ;;  %v362_v42 = vrot.slane %v360_v31, 4  ;;  %v4614_v62 = vld [vmem:[%s4539_s30 + $0x28] sm:$0xf] }
  0x1b   : > { %v330_v40 = vrot.slane %v329_v29, 4  ;;  %v340_v41 = vrot.slane %v339_v30, 4  ;;  %v368_v43 = vrot.slane %v366_v32, 5  ;;  %v1293_v45 = vrot.slane %v4570_v19, 5  ;;  %v4622_v4 = vld [vmem:[%s4539_s30 + $0x2c] sm:$0x1] }
  0x1c   : > { %v353_v44 = vor.u32 %v352_v36, %v349_v35  ;;  %v371_v47 = vshrl.u32 %v4582_v33, 16  ;;  %v374_v48 = vshll.u32 %v4582_v33, 16  ;;  %v363_v51 = vor.u32 %v362_v42, %v358_v37  ;;  %v4628_v14 = vld [vmem:[%s4539_s30 + $0x30] sm:$0xf]  ;;  %v4640_v28 = vld [vmem:[%s4539_s30 + $0x34] sm:$0xf] }
  0x1d   : > { %v335_v49 = vsel %vm4586_vm4, %v330_v40, %v334_v23  ;;  %v345_v50 = vsel %vm4586_vm4, %v340_v41, %v344_v25  ;;  %v380_v52 = vshll.u32 %v4595_v39, 16  ;;  %v384_v60 = vshrl.u32 %v4595_v39, 16  ;;  %v4635_v23 = vld [vmem:[%s5642_s1 + $0x4] sm:$0x3]  ;;  %v4647_v32 = vld [vmem:[%s4539_s30 + $0x38] sm:$0x1] }
  0x1e   : > { %v3379_v53 = vcombine.low %v335_v49, %v345_v50  ;;  %v354_v54 = vrot.slane %v353_v44, 4  ;;  %v373_v55 = vrot.slane %v371_v47, 4  ;;  %v376_v56 = vrot.slane %v374_v48, 5  ;;  %v4655_v48 = vld [vmem:[%s4539_s30 + $0x3c] sm:$0xf] }
  0x1f   : > { %v364_v58 = vrot.slane %v363_v51, 4  ;;  %v382_v59 = vrot.slane %v380_v52, 5  ;;  %v390_v61 = vshll.u32 %v4599_v46, 16  ;;  %v1297_v1 = vrot.slane %v4595_v39, 5  ;;  %v4663_v52 = vld [vmem:[%s4539_s30 + $0x40] sm:$0xf] }
  0x20   : > { %3826 = vmatprep.mubr.msk.bf16.mxu1 %vm756_vm3, %v3379_v53  ;;  %v359_v63 = vsel %vm4586_vm4, %v354_v54, %v358_v37  ;;  %v377_v0 = vor.u32 %v376_v56, %v373_v55  ;;  %v1300_v2 = vrot.slane %v4599_v46, 5  ;;  %v386_v11 = vrot.slane %v384_v60, 4 }
  0x21   : > { %v369_v5 = vsel %vm4586_vm4, %v364_v58, %v368_v43  ;;  %v392_v12 = vrot.slane %v390_v61, 5  ;;  %v395_v13 = vshrl.u32 %v4609_v57, 16  ;;  %v398_v21 = vshll.u32 %v4609_v57, 16 }
  0x22   : > { %v3380_v15 = vcombine.low %v359_v63, %v369_v5  ;;  %v378_v17 = vrot.slane %v377_v0, 4  ;;  %v404_v22 = vshll.u32 %v4614_v62, 16  ;;  %v387_v24 = vor.u32 %v386_v11, %v382_v59  ;;  %v4675_v5 = vld [vmem:[%s4539_s30 + $0x44] sm:$0x1] }
  0x23   : > { %v397_v25 = vrot.slane %v395_v13, 4  ;;  %v408_v26 = vshrl.u32 %v4614_v62, 16  ;;  %v414_v27 = vshll.u32 %v4622_v4, 16  ;;  %v400_v30 = vrot.slane %v398_v21, 5  ;;  %v4680_v13 = vld [vmem:[%s4539_s30 + $0x48] sm:$0xf] }
  0x24   : > { %3962 = vmatprep.mubr.msk.bf16.mxu0 %vm756_vm3, %v3380_v15  ;;  %3827 = vmatmul.mubr.msk.bf16.vlgmr.msra.gmra.mrb[0].mxu1 %vm756_vm3, %v3380_v15  ;;  %v383_v29 = vsel %vm4586_vm4, %v378_v17, %v382_v59  ;;  %v406_v31 = vrot.slane %v404_v22, 5  ;;  %v419_v35 = vshrl.u32 %v4628_v14, 16  ;;  %v388_v36 = vrot.slane %v387_v24, 4  ;;  %v4687_v24 = vld [vmem:[%s4539_s30 + $0x4c] sm:$0xf] }
  0x25   : > { %3859 = vmatpush3.bf16.msra.mxu1 %v4542_v6  ;;  %v410_v37 = vrot.slane %v408_v26, 4  ;;  %v416_v40 = vrot.slane %v414_v27, 5  ;;  %v422_v41 = vshll.u32 %v4628_v14, 16  ;;  %v401_v42 = vor.u32 %v400_v30, %v397_v25 }
  0x26   : > { %v421_v43 = vrot.slane %v419_v35, 4  ;;  %v428_v44 = vshll.u32 %v4640_v28, 16  ;;  %v432_v47 = vshrl.u32 %v4640_v28, 16  ;;  %4390 = vmatprep.subr.msk.bf16.mxu1 %vm805_vm0, %v4635_v23  ;;  %v393_v49 = vsel %vm4586_vm4, %v388_v36, %v392_v12 }
  0x27   : > { %v411_v6 = vor.u32 %v410_v37, %v406_v31  ;;  %v424_v50 = vrot.slane %v422_v41, 5  ;;  %v438_v51 = vshll.u32 %v4647_v32, 16  ;;  %v4665_v53 = vcombine.low %v383_v29, %v393_v49 }
  0x28   : > { %v402_v54 = vrot.slane %v401_v42, 4  ;;  %v430_v55 = vrot.slane %v428_v44, 5  ;;  %v434_v56 = vrot.slane %v432_v47, 4  ;;  %v443_v61 = vshrl.u32 %v4655_v48, 16  ;;  %v4709_v42 = vld [vmem:[%s4539_s30 + $0x54] sm:$0xf] }
  0x29   : > { %5680 = vst [vmem:[#allocation3_spill] sm:$0xff] %v4665_v53  ;;  %v412_v58 = vrot.slane %v411_v6, 4  ;;  %v425_v59 = vor.u32 %v424_v50, %v421_v43  ;;  %v440_v60 = vrot.slane %v438_v51, 5  ;;  %3963 = vmatmul.mubr.msk.bf16.vlgmr.msra.gmra.mrb[0].mxu0 %vm756_vm3, %v4665_v53  ;;  %3830 = vmatprep.mubr.msk.bf16.mxu1 %vm756_vm3, %v4665_v53  ;;  %v446_v11 = vshll.u32 %v4655_v48, 16  ;;  %5682 = vst [vmem:[#allocation5_spill] sm:$0xff] %v4709_v42 }
  0x2a   : > { %v407_v63 = vsel %vm4586_vm4, %v402_v54, %v406_v31  ;;  %v435_v0 = vor.u32 %v434_v56, %v430_v55  ;;  %v452_v12 = vshll.u32 %v4663_v52, 16  ;;  %3995 = vmatpush3.bf16.msra.mxu0 %v4545_v7  ;;  %v445_v21 = vrot.slane %v443_v61, 4  ;;  %v4714_v6 = vld [vmem:[%s4539_s30 + $0x58] sm:$0xf] }
  0x2b   : > { %v417_v15 = vsel %vm4586_vm4, %v412_v58, %v416_v40  ;;  %v426_v17 = vrot.slane %v425_v59, 4  ;;  %v456_v22 = vshrl.u32 %v4663_v52, 16  ;;  %v448_v27 = vrot.slane %v446_v11, 5  ;;  %4395 = vmatprep.subr.msk.bf16.mxu0 %vm805_vm0, %v4550_v8  ;;  %v4704_v8 = vld [vmem:[%s4539_s30 + $0x50] sm:$0x1] }
  0x2c   : > { %v4689_v25 = vcombine.low %v407_v63, %v417_v15  ;;  %v436_v26 = vrot.slane %v435_v0, 4  ;;  %v454_v29 = vrot.slane %v452_v12, 5  ;;  %v462_v31 = vshll.u32 %v4675_v5, 16  ;;  %v4727_v11 = vld [vmem:[%s4539_s30 + $0x5c] sm:$0x1] }
  0x2d   : > { %v431_v7 = vsel %vm4586_vm4, %v426_v17, %v430_v55  ;;  %v458_v30 = vrot.slane %v456_v22, 4  ;;  %v467_v35 = vshrl.u32 %v4680_v13, 16  ;;  %v449_v37 = vor.u32 %v448_v27, %v445_v21  ;;  %v4731_v15 = vld [vmem:[%s4539_s30 + $0x60] sm:$0xf]  ;;  %v4736_v27 = vld [vmem:[%s4539_s30 + $0x64] sm:$0xf] }
  0x2e   : > { %5681 = vst [vmem:[#allocation4_spill] sm:$0xff] %v4689_v25  ;;  %3966 = vmatprep.mubr.msk.bf16.mxu0 %vm756_vm3, %v4689_v25  ;;  %3831 = vmatmul.mubr.msk.bf16.gmra.mrb[4].mxu1 %vm756_vm3, %v4689_v25  ;;  %v441_v36 = vsel %vm4586_vm4, %v436_v26, %v440_v60  ;;  %v470_v40 = vshll.u32 %v4680_v13, 16  ;;  %v476_v41 = vshll.u32 %v4687_v24, 16  ;;  %v464_v47 = vrot.slane %v462_v31, 5  ;;  %v4948_v25 = vld [vmem:[%s4539_s30 + $0xa8] sm:$0xf] }
  0x2f   : > { %v4711_v43 = vcombine.low %v431_v7, %v441_v36  ;;  %v459_v44 = vor.u32 %v458_v30, %v454_v29  ;;  %v469_v49 = vrot.slane %v467_v35, 4  ;;  %v450_v50 = vrot.slane %v449_v37, 4 }
  0x30   : > { %v472_v51 = vrot.slane %v470_v40, 5  ;;  %v478_v54 = vrot.slane %v476_v41, 5  ;;  %v480_v55 = vshrl.u32 %v4687_v24, 16  ;;  %v486_v58 = vshll.u32 %v4704_v8, 16 }
  0x31   : > { %5683 = vst [vmem:[#allocation6_spill] sm:$0xff] %v4711_v43  ;;  %3834 = vmatprep.mubr.msk.bf16.mxu1 %vm756_vm3, %v4711_v43  ;;  %v460_v56 = vrot.slane %v459_v44, 4  ;;  %v491_v59 = vshrl.u32 %v4709_v42, 16  ;;  %v494_v60 = vshll.u32 %v4709_v42, 16  ;;  %3967 = vmatmul.mubr.msk.bf16.gmra.mrb[4].mxu0 %vm756_vm3, %v4711_v43  ;;  %v455_v61 = vsel %vm4586_vm4, %v450_v50, %v454_v29 }
  0x32   : > { %v473_v63 = vor.u32 %v472_v51, %v469_v49  ;;  %v482_v0 = vrot.slane %v480_v55, 4  ;;  %v500_v12 = vshll.u32 %v4714_v6, 16  ;;  %v488_v21 = vrot.slane %v486_v58, 5 }
  0x33   : > { %v465_v17 = vsel %vm4586_vm4, %v460_v56, %v464_v47  ;;  %v493_v22 = vrot.slane %v491_v59, 4  ;;  %v496_v26 = vrot.slane %v494_v60, 5  ;;  %v504_v36 = vshrl.u32 %v4714_v6, 16  ;;  %v4750_v47 = vld [vmem:[%s4539_s30 + $0x68] sm:$0x1] }
  0x34   : > { %v4738_v7 = vcombine.low %v455_v61, %v465_v17  ;;  %v474_v29 = vrot.slane %v473_v63, 4  ;;  %v483_v30 = vor.u32 %v482_v0, %v478_v54  ;;  %v502_v31 = vrot.slane %v500_v12, 5 }
  0x35   : > { %v497_v35 = vor.u32 %v496_v26, %v493_v22  ;;  %v510_v37 = vshll.u32 %v4727_v11, 16  ;;  %v515_v40 = vshrl.u32 %v4731_v15, 16  ;;  %v518_v49 = vshll.u32 %v4731_v15, 16 }
  0x36   : > { %5684 = vst [vmem:[#allocation7_spill] sm:$0xff] %v4738_v7  ;;  %3970 = vmatprep.mubr.msk.bf16.mxu0 %vm756_vm3, %v4738_v7  ;;  %3835 = vmatmul.mubr.msk.bf16.gmra.mrb[8].mxu1 %vm756_vm3, %v4738_v7  ;;  %v479_v41 = vsel %vm4586_vm4, %v474_v29, %v478_v54  ;;  %v484_v44 = vrot.slane %v483_v30, 4  ;;  %v524_v50 = vshll.u32 %v4736_v27, 16  ;;  %v506_v55 = vrot.slane %v504_v36, 4  ;;  %v4758_v54 = vld [vmem:[%s4539_s30 + $0x6c] sm:$0xf] }
  0x37   : > { %v498_v51 = vrot.slane %v497_v35, 4  ;;  %v512_v56 = vrot.slane %v510_v37, 5  ;;  %v517_v58 = vrot.slane %v515_v40, 4  ;;  %v520_v60 = vrot.slane %v518_v49, 5  ;;  %v4774_v36 = vld [vmem:[%s4539_s30 + $0x70] sm:$0xf] }
  0x38   : > { %v489_v59 = vsel %vm4586_vm4, %v484_v44, %v488_v21  ;;  %v526_v61 = vrot.slane %v524_v50, 5  ;;  %v528_v63 = vshrl.u32 %v4736_v27, 16  ;;  %v507_v17 = vor.u32 %v506_v55, %v502_v31  ;;  %v4925_v7 = vld [vmem:[%s4539_s30 + $0xa0] sm:$0xf] }
  0x39   : > { %v4760_v0 = vcombine.low %v479_v41, %v489_v59  ;;  %v503_v12 = vsel %vm4586_vm4, %v498_v51, %v502_v31  ;;  %v534_v22 = vshll.u32 %v4750_v47, 16  ;;  %v521_v21 = vor.u32 %v520_v60, %v517_v58  ;;  %v4787_v51 = vld [vmem:[%s4539_s30 + $0x74] sm:$0x1] }
  0x3a   : > { %v530_v29 = vrot.slane %v528_v63, 4  ;;  %v3444_v30 = vrot.slane %v4564_v16, 9  ;;  %v1290_v35 = vrot.slane %v4567_v18, 5  ;;  %v508_v31 = vrot.slane %v507_v17, 4 }
  0x3b   : > { %5685 = vst [vmem:[#allocation8_spill] sm:$0xff] %v4760_v0  ;;  %3971 = vmatmul.mubr.msk.bf16.gmra.mrb[8].mxu0 %vm756_vm3, %v4760_v0  ;;  %3838 = vmatprep.mubr.msk.bf16.mxu1 %vm756_vm3, %v4760_v0  ;;  %v536_v37 = vrot.slane %v534_v22, 5  ;;  %v539_v40 = vshrl.u32 %v4758_v54, 16  ;;  %v542_v41 = vshll.u32 %v4758_v54, 16  ;;  %v522_v44 = vrot.slane %v521_v21, 4 }
  0x3c   : > { %v531_v49 = vor.u32 %v530_v29, %v526_v61  ;;  %v1291_v16 = vsel %vm4767_vm7, %v3444_v30, %v1290_v35  ;;  %v1292_v18 = vrot.slane %v1290_v35, 4  ;;  %v513_v50 = vsel %vm4586_vm4, %v508_v31, %v512_v56  ;;  %v4799_v56 = vld [vmem:[%s4539_s30 + $0x78] sm:$0xf]  ;;  %v4815_v31 = vld [vmem:[%s4539_s30 + $0x7c] sm:$0xf] }
  0x3d   : > { %v541_v55 = vrot.slane %v539_v40, 4  ;;  %v544_v58 = vrot.slane %v542_v41, 5  ;;  %v548_v59 = vshll.u32 %v4774_v36, 16  ;;  %v4790_v60 = vcombine.low %v503_v12, %v513_v50 }
  0x3e   : > { %v527_v63 = vsel %vm4586_vm4, %v522_v44, %v526_v61  ;;  %v532_v17 = vrot.slane %v531_v49, 4  ;;  %v1294_v22 = vsel %vm4767_vm7, %v1292_v18, %v1293_v45  ;;  %v552_v35 = vshrl.u32 %v4774_v36, 16  ;;  %v4820_v49 = vld [vmem:[%s4539_s30 + $0x80] sm:$0x1] }
  0x3f   : > { %5688 = vst [vmem:[#allocation9_spill] sm:$0xff] %v4790_v60  ;;  %v4801_v21 = vcombine.low %v1291_v16, %v1294_v22  ;;  %v545_v29 = vor.u32 %v544_v58, %v541_v55  ;;  %v550_v30 = vrot.slane %v548_v59, 5  ;;  %3974 = vmatprep.mubr.msk.bf16.mxu0 %vm756_vm3, %v4790_v60  ;;  %3839 = vmatmul.mubr.msk.bf16.gmra.mrb[12].mxu1 %vm756_vm3, %v4790_v60  ;;  %v558_v45 = vshll.u32 %v4787_v51, 16  ;;  %v4918_v60 = vld [vmem:[%s4539_s30 + $0x9c] sm:$0xf] }
  0x40   : > { %v537_v19 = vsel %vm4586_vm4, %v532_v17, %v536_v37  ;;  %v3445_v61 = vrot.slane %v4582_v33, 9  ;;  %v1299_v12 = vrot.slane %v1297_v1, 4  ;;  %v554_v44 = vrot.slane %v552_v35, 4 }
  0x41   : > { %5689 = vst [vmem:[#allocation10_spill] sm:$0xff] %v4801_v21  ;;  %v4817_v40 = vcombine.low %v527_v63, %v537_v19  ;;  %v546_v41 = vrot.slane %v545_v29, 4  ;;  %v563_v16 = vshrl.u32 %v4799_v56, 16  ;;  %v560_v18 = vrot.slane %v558_v45, 5  ;;  %v4846_v29 = vld [vmem:[%s4539_s30 + $0x84] sm:$0xf] }
  0x42   : > { %v1298_v37 = vsel %vm4767_vm7, %v3445_v61, %v1297_v1  ;;  %v1301_v50 = vsel %vm4767_vm7, %v1299_v12, %v1300_v2  ;;  %v566_v55 = vshll.u32 %v4799_v56, 16  ;;  %v555_v59 = vor.u32 %v554_v44, %v550_v30 }
  0x43   : > { %5690 = vst [vmem:[#allocation11_spill] sm:$0xff] %v4817_v40  ;;  %3975 = vmatmul.mubr.msk.bf16.gmra.mrb[12].mxu0 %vm756_vm3, %v4817_v40  ;;  %3842 = vmatprep.mubr.msk.bf16.mxu1 %vm756_vm3, %v4817_v40  ;;  %v551_v58 = vsel %vm4586_vm4, %v546_v41, %v550_v30  ;;  %v4838_v63 = vcombine.low %v1298_v37, %v1301_v50  ;;  %v565_v1 = vrot.slane %v563_v16, 4  ;;  %v572_v2 = vshll.u32 %v4815_v31, 16  ;;  %v4852_v16 = vld [vmem:[%s4539_s30 + $0x88] sm:$0xf] }
  0x44   : > { %3996 = vmatprep.mubr.msk.bf16.mxu0 %vm756_vm3, %v4801_v21  ;;  %v568_v46 = vrot.slane %v566_v55, 5  ;;  %v576_v17 = vshrl.u32 %v4815_v31, 16  ;;  %v582_v22 = vshll.u32 %v4820_v49, 16  ;;  %v556_v35 = vrot.slane %v555_v59, 4 }
  0x45   : > { %5691 = vst [vmem:[#allocation12_spill] sm:$0xff] %v4838_v63  ;;  %v3446_v30 = vrot.slane %v4609_v57, 9  ;;  %v1304_v19 = vrot.slane %v4614_v62, 5  ;;  %v1307_v45 = vrot.slane %v4622_v4, 5  ;;  %v574_v12 = vrot.slane %v572_v2, 5 }
  0x46   : > { %v569_v61 = vor.u32 %v568_v46, %v565_v1  ;;  %v578_v41 = vrot.slane %v576_v17, 4  ;;  %v584_v44 = vrot.slane %v582_v22, 5  ;;  %v561_v37 = vsel %vm4586_vm4, %v556_v35, %v560_v18  ;;  %v4862_v1 = vld [vmem:[%s4539_s30 + $0x8c] sm:$0x1] }
  0x47   : > { %v1305_v50 = vsel %vm4767_vm7, %v3446_v30, %v1304_v19  ;;  %v1306_v55 = vrot.slane %v1304_v19, 4  ;;  %v587_v59 = vshrl.u32 %v4846_v29, 16  ;;  %v4859_v3 = vcombine.low %v551_v58, %v561_v37 }
  0x48   : > { %v570_v40 = vrot.slane %v569_v61, 4  ;;  %v579_v4 = vor.u32 %v578_v41, %v574_v12  ;;  %v590_v46 = vshll.u32 %v4846_v29, 16  ;;  %v596_v18 = vshll.u32 %v4852_v16, 16  ;;  %v4876_v61 = vld [vmem:[%s4539_s30 + $0x90] sm:$0xf] }
  0x49   : > { %5692 = vst [vmem:[#allocation13_spill] sm:$0xff] %v4859_v3  ;;  %v1308_v2 = vsel %vm4767_vm7, %v1306_v55, %v1307_v45  ;;  %v589_v17 = vrot.slane %v587_v59, 4  ;;  %v600_v22 = vshrl.u32 %v4852_v16, 16  ;;  %3843 = vmatmul.mubr.msk.bf16.gmra.mrb[16].mxu1 %vm756_vm3, %v4859_v3  ;;  %v4881_v45 = vld [vmem:[%s5642_s1 + $0xe] sm:$0x3]  ;;  %v1311_v59 = vrot.slane %v4640_v28, 5 }
  0x4a   : > { %v575_v58 = vsel %vm4586_vm4, %v570_v40, %v574_v12  ;;  %v580_v35 = vrot.slane %v579_v4, 4  ;;  %v4873_v30 = vcombine.low %v1305_v50, %v1308_v2  ;;  %v592_v19 = vrot.slane %v590_v46, 5  ;;  %5694 = vst [vmem:[#allocation15_spill] sm:$0xff] %v4881_v45  ;;  %v4895_v46 = vld [vmem:[%s4539_s30 + $0x94] sm:$0xf] }
  0x4b   : > { %3997 = vmatmul.mubr.msk.bf16.vlgmr.msra.gmra.mrb[0].mxu0 %vm756_vm3, %v4838_v63  ;;  %v598_v41 = vrot.slane %v596_v18, 5  ;;  %v602_v37 = vrot.slane %v600_v22, 4  ;;  %v606_v40 = vshll.u32 %v4862_v1, 16  ;;  %v3447_v12 = vrot.slane %v4628_v14, 9  ;;  %v4900_v3 = vld [vmem:[%s4539_s30 + $0x98] sm:$0x1] }
  0x4c   : > { %5693 = vst [vmem:[#allocation14_spill] sm:$0xff] %v4873_v30  ;;  %4029 = vmatpush3.bf16.msra.mxu0 %v4574_v20  ;;  %v585_v50 = vsel %vm4586_vm4, %v580_v35, %v584_v44  ;;  %4000 = vmatprep.mubr.msk.bf16.mxu0 %vm756_vm3, %v4873_v30  ;;  %v593_v55 = vor.u32 %v592_v19, %v589_v17  ;;  %v1314_v4 = vrot.slane %v4647_v32, 5  ;;  %v611_v20 = vshrl.u32 %v4876_v61, 16 }
  0x4d   : > { %v4897_v2 = vcombine.low %v575_v58, %v585_v50  ;;  %v603_v18 = vor.u32 %v602_v37, %v598_v41  ;;  %v608_v22 = vrot.slane %v606_v40, 5  ;;  %4396 = vmatprep.subr.msk.bf16.mxu0 %vm805_vm0, %v4881_v45  ;;  %v1312_v17 = vsel %vm4767_vm7, %v3447_v12, %v1311_v59 }
  0x4e   : > { %v594_v44 = vrot.slane %v593_v55, 4  ;;  %v1313_v35 = vrot.slane %v1311_v59, 4  ;;  %v614_v32 = vshll.u32 %v4876_v61, 16  ;;  %v613_v19 = vrot.slane %v611_v20, 4 }
  0x4f   : > { %5695 = vst [vmem:[#allocation16_spill] sm:$0xff] %v4897_v2  ;;  %3846 = vmatprep.mubr.msk.bf16.mxu1 %vm756_vm3, %v4897_v2  ;;  %v604_v58 = vrot.slane %v603_v18, 4  ;;  %v620_v37 = vshll.u32 %v4895_v46, 16  ;;  %v624_v40 = vshrl.u32 %v4895_v46, 16  ;;  %v630_v59 = vshll.u32 %v4900_v3, 16 }
  0x50   : > { %v599_v50 = vsel %vm4586_vm4, %v594_v44, %v598_v41  ;;  %v1315_v55 = vsel %vm4767_vm7, %v1313_v35, %v1314_v4  ;;  %v616_v12 = vrot.slane %v614_v32, 5  ;;  %v3448_v4 = vrot.slane %v4655_v48, 9 }
  0x51   : > { %v609_v2 = vsel %vm4586_vm4, %v604_v58, %v608_v22  ;;  %v4922_v18 = vcombine.low %v1312_v17, %v1315_v55  ;;  %v622_v20 = vrot.slane %v620_v37, 5  ;;  %v626_v0 = vrot.slane %v624_v40, 4  ;;  %v4938_v58 = vld [vmem:[%s4539_s30 + $0xa4] sm:$0x1] }
  0x52   : > { %v4927_v43 = vcombine.low %v599_v50, %v609_v2  ;;  %v617_v41 = vor.u32 %v616_v12, %v613_v19  ;;  %v632_v44 = vrot.slane %v630_v59, 5  ;;  %v1318_v32 = vrot.slane %v4663_v52, 5 }
  0x53   : > { %5696 = vst [vmem:[#allocation17_spill] sm:$0xff] %v4922_v18  ;;  %4001 = vmatmul.mubr.msk.bf16.gmra.mrb[4].mxu0 %vm756_vm3, %v4922_v18  ;;  %v627_v35 = vor.u32 %v626_v0, %v622_v20  ;;  %v1321_v22 = vrot.slane %v4675_v5, 5  ;;  %v635_v17 = vshrl.u32 %v4918_v60, 16  ;;  %v638_v19 = vshll.u32 %v4918_v60, 16 }
  0x54   : > { %5697 = vst [vmem:[#allocation18_spill] sm:$0xff] %v4927_v43  ;;  %3847 = vmatmul.mubr.msk.bf16.gmra.mrb[20].mxu1 %vm756_vm3, %v4927_v43  ;;  %v618_v2 = vrot.slane %v617_v41, 4  ;;  %v644_v37 = vshll.u32 %v4925_v7, 16  ;;  %v648_v0 = vshrl.u32 %v4925_v7, 16  ;;  %v1319_v5 = vsel %vm4767_vm7, %v3448_v4, %v1318_v32 }
  0x55   : > { %v628_v40 = vrot.slane %v627_v35, 4  ;;  %v1320_v50 = vrot.slane %v1318_v32, 4  ;;  %v637_v55 = vrot.slane %v635_v17, 4  ;;  %v640_v59 = vrot.slane %v638_v19, 5  ;;  %v4957_v32 = vld [vmem:[%s4539_s30 + $0xac] sm:$0xf] }
  0x56   : > { %v623_v12 = vsel %vm4586_vm4, %v618_v2, %v622_v20  ;;  %v646_v41 = vrot.slane %v644_v37, 5  ;;  %v650_v43 = vrot.slane %v648_v0, 4  ;;  %v654_v35 = vshll.u32 %v4938_v58, 16 }
  0x57   : > { %v633_v53 = vsel %vm4586_vm4, %v628_v40, %v632_v44  ;;  %v1322_v18 = vsel %vm4767_vm7, %v1320_v50, %v1321_v22  ;;  %v3449_v4 = vrot.slane %v4680_v13, 9  ;;  %v641_v2 = vor.u32 %v640_v59, %v637_v55 }
  0x58   : > { %v4959_v17 = vcombine.low %v623_v12, %v633_v53  ;;  %v4961_v20 = vcombine.low %v1319_v5, %v1322_v18  ;;  %v651_v19 = vor.u32 %v650_v43, %v646_v41  ;;  %v656_v37 = vrot.slane %v654_v35, 5  ;;  %v4971_v18 = vld [vmem:[%s4539_s30 + $0xb0] sm:$0x1] }
  0x59   : > { %v1325_v0 = vrot.slane %v4687_v24, 5  ;;  %v1328_v44 = vrot.slane %v4704_v8, 5  ;;  %v659_v22 = vshrl.u32 %v4948_v25, 16  ;;  %v642_v53 = vrot.slane %v641_v2, 4 }
  0x5a   : > { %5698 = vst [vmem:[#allocation19_spill] sm:$0xff] %v4959_v17  ;;  %5699 = vst [vmem:[#allocation20_spill] sm:$0xff] %v4961_v20  ;;  %3850 = vmatprep.mubr.msk.bf16.mxu1 %vm756_vm3, %v4959_v17  ;;  %4004 = vmatprep.mubr.msk.bf16.mxu0 %vm756_vm3, %v4961_v20  ;;  %v652_v40 = vrot.slane %v651_v19, 4  ;;  %v662_v43 = vshll.u32 %v4948_v25, 16  ;;  %v668_v5 = vshll.u32 %v4957_v32, 16  ;;  %v672_v12 = vshrl.u32 %v4957_v32, 16 }
  0x5b   : > { %v1326_v8 = vsel %vm4767_vm7, %v3449_v4, %v1325_v0  ;;  %v1327_v50 = vrot.slane %v1325_v0, 4  ;;  %v661_v55 = vrot.slane %v659_v22, 4  ;;  %v647_v59 = vsel %vm4586_vm4, %v642_v53, %v646_v41  ;;  %v4983_v17 = vld [vmem:[%s4539_s30 + $0xb4] sm:$0xf]  ;;  %v4995_v53 = vld [vmem:[%s4539_s30 + $0xb8] sm:$0xf] }
  0x5c   : > { %v657_v35 = vsel %vm4586_vm4, %v652_v40, %v656_v37  ;;  %v664_v2 = vrot.slane %v662_v43, 5  ;;  %v670_v19 = vrot.slane %v668_v5, 5  ;;  %v674_v0 = vrot.slane %v672_v12, 4 }
  0x5d   : > { %v4985_v20 = vcombine.low %v647_v59, %v657_v35  ;;  %v1329_v4 = vsel %vm4767_vm7, %v1327_v50, %v1328_v44  ;;  %v678_v22 = vshll.u32 %v4971_v18, 16  ;;  %v3450_v41 = vrot.slane %v4709_v42, 9  ;;  %v5001_v44 = vld [vmem:[%s4539_s30 + $0xbc] sm:$0x1] }
  0x5e   : > { %v4990_v30 = vcombine.low %v1326_v8, %v1329_v4  ;;  %v665_v63 = vor.u32 %v664_v2, %v661_v55  ;;  %v1332_v37 = vrot.slane %v4714_v6, 5  ;;  %v675_v40 = vor.u32 %v674_v0, %v670_v19 }
  0x5f   : > { %5700 = vst [vmem:[#allocation21_spill] sm:$0xff] %v4985_v20  ;;  %3851 = vmatmul.mubr.msk.bf16.gmra.mrb[24].mxu1 %vm756_vm3, %v4985_v20  ;;  %v680_v43 = vrot.slane %v678_v22, 5  ;;  %v1335_v5 = vrot.slane %v4727_v11, 5  ;;  %v683_v50 = vshrl.u32 %v4983_v17, 16  ;;  %v686_v59 = vshll.u32 %v4983_v17, 16 }
  0x60   : > { %5701 = vst [vmem:[#allocation22_spill] sm:$0xff] %v4990_v30  ;;  %4005 = vmatmul.mubr.msk.bf16.gmra.mrb[8].mxu0 %vm756_vm3, %v4990_v30  ;;  %v666_v8 = vrot.slane %v665_v63, 4  ;;  %v1333_v55 = vsel %vm4767_vm7, %v3450_v41, %v1332_v37  ;;  %v1334_v12 = vrot.slane %v1332_v37, 4  ;;  %v676_v35 = vrot.slane %v675_v40, 4 }
  0x61   : > { %v685_v2 = vrot.slane %v683_v50, 4  ;;  %v692_v4 = vshll.u32 %v4995_v53, 16  ;;  %v696_v11 = vshrl.u32 %v4995_v53, 16  ;;  %v688_v20 = vrot.slane %v686_v59, 5 }
  0x62   : > { %v671_v0 = vsel %vm4586_vm4, %v666_v8, %v670_v19  ;;  %v1336_v22 = vsel %vm4767_vm7, %v1334_v12, %v1335_v5  ;;  %v702_v63 = vshll.u32 %v5001_v44, 16  ;;  %v681_v41 = vsel %vm4586_vm4, %v676_v35, %v680_v43 }
  0x63   : > { %v5018_v37 = vcombine.low %v1333_v55, %v1336_v22  ;;  %v694_v40 = vrot.slane %v692_v4, 5  ;;  %v698_v50 = vrot.slane %v696_v11, 4  ;;  %v5020_v30 = vcombine.low %v671_v0, %v681_v41 }
  0x64   : > { %v689_v21 = vor.u32 %v688_v20, %v685_v2  ;;  %v704_v45 = vrot.slane %v702_v63, 5  ;;  %v3451_v42 = vrot.slane %v4731_v15, 9  ;;  %v1339_v5 = vrot.slane %v4736_v27, 5 }
  0x65   : > { %4008 = vmatprep.mubr.msk.bf16.mxu0 %vm756_vm3, %v5018_v37  ;;  %v699_v19 = vor.u32 %v698_v50, %v694_v40  ;;  %v1342_v8 = vrot.slane %v4750_v47, 5  ;;  %v3452_v43 = vrot.slane %v4758_v54, 9  ;;  %3854 = vmatprep.mubr.msk.bf16.mxu1 %vm756_vm3, %v5020_v30  ;;  %v3411_v20 = vcombine.low %v4553_v9, %v4556_v10 }
  0x66   : > { %v690_v55 = vrot.slane %v689_v21, 4  ;;  %v1346_v12 = vrot.slane %v4774_v36, 5  ;;  %v1349_v59 = vrot.slane %v4787_v51, 5  ;;  %v1340_v2 = vsel %vm4767_vm7, %v3451_v42, %v1339_v5 }
  0x67   : > { %v700_v35 = vrot.slane %v699_v19, 4  ;;  %v1341_v4 = vrot.slane %v1339_v5, 4  ;;  %v1353_v47 = vrot.slane %v4815_v31, 5  ;;  %v3453_v9 = vrot.slane %v4799_v56, 9 }
  0x68   : > { %v695_v11 = vsel %vm4586_vm4, %v690_v55, %v694_v40  ;;  %v1347_v21 = vsel %vm4767_vm7, %v3452_v43, %v1346_v12  ;;  %v1348_v0 = vrot.slane %v1346_v12, 4  ;;  %v1356_v42 = vrot.slane %v4820_v49, 5 }
  0x69   : > { %v705_v10 = vsel %vm4586_vm4, %v700_v35, %v704_v45  ;;  %v1343_v51 = vsel %vm4767_vm7, %v1341_v4, %v1342_v8  ;;  %v1355_v22 = vrot.slane %v1353_v47, 4  ;;  %v3454_v19 = vrot.slane %v4846_v29, 9 }
  0x6a   : > { %v5047_v63 = vcombine.low %v695_v11, %v705_v10  ;;  %v5049_v41 = vcombine.low %v1340_v2, %v1343_v51  ;;  %v1350_v40 = vsel %vm4767_vm7, %v1348_v0, %v1349_v59  ;;  %v1360_v5 = vrot.slane %v4852_v16, 5 }
  0x6b   : > { %v5053_v50 = vcombine.low %v1347_v21, %v1350_v40  ;;  %v1363_v49 = vrot.slane %v4862_v1, 5  ;;  %v1354_v45 = vsel %vm4767_vm7, %v3453_v9, %v1353_v47  ;;  %v1357_v8 = vsel %vm4767_vm7, %v1355_v22, %v1356_v42 }
  0x6c   : > { %3855 = vmatmul.mubr.msk.bf16.gmra.mrb[28].mxu1 %vm756_vm3, %v5047_v63  ;;  %4009 = vmatmul.mubr.msk.bf16.gmra.mrb[12].mxu0 %vm756_vm3, %v5049_v41  ;;  %v1362_v43 = vrot.slane %v1360_v5, 4  ;;  %v1367_v55 = vrot.slane %v4895_v46, 5  ;;  %v1374_v12 = vrot.slane %v4925_v7, 5  ;;  %v1361_v59 = vsel %vm4767_vm7, %v3454_v19, %v1360_v5 }
  0x6d   : > { %3860 = vmatprep.mubr.msk.bf16.mxu1 %vm756_vm3, %v3411_v20  ;;  %4012 = vmatprep.mubr.msk.bf16.mxu0 %vm756_vm3, %v5053_v50  ;;  %v5075_v20 = vcombine.low %v1354_v45, %v1357_v8  ;;  %v3455_v35 = vrot.slane %v4876_v61, 9  ;;  %v1370_v4 = vrot.slane %v4900_v3, 5  ;;  %v5081_v47 = vcombine.low %v4582_v33, %v4595_v39  ;;  %v5093_v3 = vld [vmem:[%s5642_s1 + $0x6] sm:$0x3] }
  0x6e   : > { %v1364_v1 = vsel %vm4767_vm7, %v1362_v43, %v1363_v49  ;;  %v1369_v2 = vrot.slane %v1367_v55, 4  ;;  %v3456_v11 = vrot.slane %v4918_v60, 9  ;;  %v1492_v21 = vsel %vm805_vm0, %v4635_v23, 0 }
  0x6f   : > { %v5086_v0 = vcombine.low %v1361_v59, %v1364_v1  ;;  %v1376_v9 = vrot.slane %v1374_v12, 4  ;;  %v1377_v10 = vrot.slane %v4938_v58, 5  ;;  %v1381_v51 = vrot.slane %v4957_v32, 5 }
  0x70   : > { %v1368_v33 = vsel %vm4767_vm7, %v3455_v35, %v1367_v55  ;;  %v1371_v39 = vsel %vm4767_vm7, %v1369_v2, %v1370_v4  ;;  %v5107_v23 = vcombine.low %v4609_v57, %v4614_v62  ;;  %v1375_v58 = vsel %vm4767_vm7, %v3456_v11, %v1374_v12 }
  0x71   : > { %v5113_v22 = vcombine.low %v4731_v15, %v4736_v27  ;;  %v1378_v42 = vsel %vm4767_vm7, %v1376_v9, %v1377_v10  ;;  %v3457_v40 = vrot.slane %v4948_v25, 9  ;;  %v1388_v19 = vrot.slane %v4995_v53, 5 }
  0x72   : > { %v5123_v57 = vcombine.low %v4758_v54, %v4774_v36  ;;  %v5127_v62 = vcombine.low %v1368_v33, %v1371_v39  ;;  %v1383_v15 = vrot.slane %v1381_v51, 4  ;;  %v1384_v27 = vrot.slane %v4971_v18, 5  ;;  %v314_v18 = vld [vmem:[%s4539_s30 + $0xc8] sm:$0x1] }
  0x73   : > { %v5132_v5 = vcombine.low %v4799_v56, %v4815_v31  ;;  %v5136_v49 = vcombine.low %v4846_v29, %v4852_v16  ;;  %v5140_v54 = vcombine.low %v4876_v61, %v4895_v46  ;;  %v5144_v36 = vcombine.low %v4918_v60, %v4925_v7  ;;  %v5163_v61 = vld [vmem:[%s4539_s30 + $0xc4] sm:$0xf] }
  0x74   : > { %3861 = vmatmul.mubr.msk.bf16.vlgmr.msra.gmra.mrb[0].mxu1 %vm756_vm3, %v4592_v38  ;;  %4013 = vmatmul.mubr.msk.bf16.gmra.mrb[16].mxu0 %vm756_vm3, %v5075_v20  ;;  %v5148_v45 = vcombine.low %v4948_v25, %v4957_v32  ;;  %v5152_v56 = vcombine.low %v4628_v14, %v4640_v28  ;;  %v5154_v31 = vcombine.low %v1375_v58, %v1378_v42  ;;  %v3458_v16 = vrot.slane %v4983_v17, 9  ;;  %v5702_v42 = vld [vmem:[#allocation5_spill] sm:$0xff] }
  0x75   : > { %3893 = vmatpush3.bf16.msra.mxu1 %v1492_v21  ;;  %3864 = vmatprep.mubr.msk.bf16.mxu1 %vm756_vm3, %v5081_v47  ;;  %v5158_v29 = vcombine.low %v4983_v17, %v4995_v53  ;;  %v1390_v7 = vrot.slane %v1388_v19, 4  ;;  %v1391_v60 = vrot.slane %v5001_v44, 5  ;;  %v1382_v14 = vsel %vm4767_vm7, %v3457_v40, %v1381_v51  ;;  %v5183_v17 = vld [vmem:[%s4539_s30 + $0xc0] sm:$0xf] }
  0x76   : > { %4016 = vmatprep.mubr.msk.bf16.mxu0 %vm756_vm3, %v5086_v0  ;;  %4391 = vmatprep.subr.msk.bf16.mxu1 %vm805_vm0, %v5093_v3  ;;  %v1385_v28 = vsel %vm4767_vm7, %v1383_v15, %v1384_v27  ;;  %v2124_v25 = vrot.slane %v5163_v61, 5  ;;  %v1389_v46 = vsel %vm4767_vm7, %v3458_v16, %v1388_v19  ;;  %v5188_v53 = vcombine.low %v4655_v48, %v4663_v52 }
  0x77   : > { %v1392_v32 = vsel %vm4767_vm7, %v1390_v7, %v1391_v60  ;;  %v5190_v44 = vcombine.low %v1382_v14, %v1385_v28  ;;  %v5194_v8 = vcombine.low %v4680_v13, %v4687_v24  ;;  %v1894_v43 = vshrl.u32 %v5183_v17, 16  ;;  %v3584_v60 = vld [vmem:[%s5642_s1 + $0x10] sm:$0x3]  ;;  %v4441_v14 = vld [vmem:[%s4539_s30 + $0x4] sm:$0xf] }
  0x78   : > { %v1897_v55 = vshll.u32 %v5183_v17, 16  ;;  %v1903_v12 = vshll.u32 %v5163_v61, 16  ;;  %v1907_v59 = vshrl.u32 %v5163_v61, 16  ;;  %v5200_v1 = vcombine.low %v1389_v46, %v1392_v32  ;;  %v4443_v32 = vld [vmem:[%s4539_s30] sm:$0xf] }
  0x79   : > { %v3528_v35 = vrot.slane %v5183_v17, 9  ;;  %v2126_v48 = vrot.slane %v2124_v25, 4  ;;  %v2127_v52 = vrot.slane %v314_v18, 5  ;;  %v1896_v2 = vrot.slane %v1894_v43, 4 }
  0x7a   : > { %v1899_v4 = vrot.slane %v1897_v55, 5  ;;  %v1905_v11 = vrot.slane %v1903_v12, 5  ;;  %v1909_v21 = vrot.slane %v1907_v59, 4  ;;  %v1913_v9 = vshll.u32 %v314_v18, 16 }
  0x7b   : > { %v2125_v10 = vsel %vm4767_vm7, %v3528_v35, %v2124_v25  ;;  %v2128_v51 = vsel %vm4767_vm7, %v2126_v48, %v2127_v52  ;;  %v5217_v40 = vcombine.low %v5702_v42, %v4714_v6  ;;  %v5703_v6 = vld [vmem:[#allocation15_spill] sm:$0xff]  ;;  %v1283_v28 = vrot.slane %v4441_v14, 5  ;;  %v5704_v48 = vld [vmem:[#allocation10_spill] sm:$0xff]  ;;  %v5705_v52 = vld [vmem:[#allocation12_spill] sm:$0xff] }
  0x7c   : > { %3865 = vmatmul.mubr.msk.bf16.gmra.mrb[4].mxu1 %vm756_vm3, %v5107_v23  ;;  %4017 = vmatmul.mubr.msk.bf16.gmra.mrb[20].mxu0 %vm756_vm3, %v5127_v62  ;;  %v1900_v13 = vor.u32 %v1899_v4, %v1896_v2  ;;  %v1910_v24 = vor.u32 %v1909_v21, %v1905_v11  ;;  %v1915_v58 = vrot.slane %v1913_v9, 5  ;;  %v5219_v19 = vcombine.low %v2125_v10, %v2128_v51  ;;  %v4442_v25 = vld [vmem:[%s4539_s30 + $0x8] sm:$0x1]  ;;  %v5707_v4 = vld [vmem:[#allocation17_spill] sm:$0xff]  ;;  %v5708_v21 = vld [vmem:[#allocation20_spill] sm:$0xff] }
  0x7d   : > { %3868 = vmatprep.mubr.msk.bf16.mxu1 %vm756_vm3, %v5152_v56  ;;  %4020 = vmatprep.mubr.msk.bf16.mxu0 %vm756_vm3, %v5154_v31  ;;  %v2572_v7 = vsel %vm805_vm0, %v5703_v6, 0  ;;  %v1286_v46 = vrot.slane %v4442_v25, 5  ;;  %v3443_v18 = vrot.slane %v4443_v32, 9  ;;  %v1285_v43 = vrot.slane %v1283_v28, 4  ;;  %v4444_v2 = vld [vmem:[%s5642_s1 + $0x8] sm:$0x3] }
  0x7e   : > { %v1901_v33 = vrot.slane %v1900_v13, 4  ;;  %v1911_v39 = vrot.slane %v1910_v24, 4  ;;  %v1698_v35 = vsel %vm805_vm0, %v5093_v3, 0  ;;  %v5706_v3 = vld [vmem:[#allocation14_spill] sm:$0xff]  ;;  %v5314_v24 = vld [vmem:[%s4539_s30 + $0xcc] sm:$0xf] }
  0x7f   : > { %v1284_v55 = vsel %vm4767_vm7, %v3443_v18, %v1283_v28  ;;  %v1287_v12 = vsel %vm4767_vm7, %v1285_v43, %v1286_v46  ;;  %v5709_v13 = vld [vmem:[#allocation22_spill] sm:$0xff]  ;;  %v5317_v9 = vld [vmem:[%s4539_s30 + $0xd0] sm:$0xf]  ;;  %v2784_v10 = vsel %vm805_vm0, %v3584_v60, 0  ;;  %v5715_v42 = vld [vmem:[#allocation9_spill] sm:$0xff]  ;;  %v2543_v14 = vshll.u32 %v5314_v24, 16 }
  0x80   : > { %v1906_v15 = vsel %vm4586_vm4, %v1901_v33, %v1905_v11  ;;  %v1916_v27 = vsel %vm4586_vm4, %v1911_v39, %v1915_v58  ;;  %v3460_v59 = vcombine.low %v1284_v55, %v1287_v12  ;;  %v5303_v11 = vcombine.low %v5183_v17, %v5163_v61  ;;  %v5710_v17 = vld [vmem:[#allocation3_spill] sm:$0xff]  ;;  %v5711_v51 = vld [vmem:[#allocation4_spill] sm:$0xff]  ;;  %v5712_v33 = vld [vmem:[#allocation6_spill] sm:$0xff] }
  0x81   : > { %v5225_v16 = vcombine.low %v1906_v15, %v1916_v27  ;;  %v3548_v61 = vcombine.low %v5314_v24, %v5317_v9  ;;  %v5713_v39 = vld [vmem:[#allocation7_spill] sm:$0xff]  ;;  %v5714_v58 = vld [vmem:[#allocation8_spill] sm:$0xff]  ;;  %v5717_v27 = vld [vmem:[#allocation13_spill] sm:$0xff]  ;;  %v2553_v28 = vshrl.u32 %v5317_v9, 16  ;;  %v2545_v32 = vrot.slane %v2543_v14, 5 }
  0x82   : > { %v5716_v15 = vld [vmem:[#allocation11_spill] sm:$0xff]  ;;  %v5718_v6 = vld [vmem:[#allocation16_spill] sm:$0xff]  ;;  %v5720_v25 = vld [vmem:[#allocation2_spill] sm:$0xff]  ;;  %v2770_v34 = vrot.slane %v5317_v9, 5 }
  0x83   : > { %v5721_v46 = vld [vmem:[#allocation19_spill] sm:$0xff]  ;;  %v2555_v43 = vrot.slane %v2553_v28, 4  ;;  %v317_v55 = vld [vmem:[%s4539_s30 + $0xd4] sm:$0x1]  ;;  %v5722_v12 = vld [vmem:[#allocation21_spill] sm:$0xff] }
  0x84   : > { %3869 = vmatmul.mubr.msk.bf16.gmra.mrb[8].mxu1 %vm756_vm3, %v5188_v53  ;;  %4021 = vmatmul.mubr.msk.bf16.gmra.mrb[24].mxu0 %vm756_vm3, %v5190_v44 }
  0x85   : > { %3872 = vmatprep.mubr.msk.bf16.mxu1 %vm756_vm3, %v5194_v8  ;;  %4024 = vmatprep.mubr.msk.bf16.mxu0 %vm756_vm3, %v5200_v1 }
  0x8c   : > { %3873 = vmatmul.mubr.msk.bf16.gmra.mrb[12].mxu1 %vm756_vm3, %v5217_v40  ;;  %4025 = vmatmul.mubr.msk.bf16.gmra.mrb[28].mxu0 %vm756_vm3, %v5219_v19 }
  0x8d   : > { %3876 = vmatprep.mubr.msk.bf16.mxu1 %vm756_vm3, %v5113_v22  ;;  %4030 = vmatprep.mubr.msk.bf16.mxu0 %vm756_vm3, %v5081_v47 }
  0x94   : > { %3877 = vmatmul.mubr.msk.bf16.gmra.mrb[16].mxu1 %vm756_vm3, %v5123_v57  ;;  %4031 = vmatmul.mubr.msk.bf16.vlgmr.msra.gmra.mrb[0].mxu0 %vm756_vm3, %v5107_v23 }
  0x95   : > { %4063 = vmatpush3.bf16.msra.mxu0 %v2572_v7  ;;  %3880 = vmatprep.mubr.msk.bf16.mxu1 %vm756_vm3, %v5132_v5  ;;  %v5719_v7 = vld [vmem:[#allocation18_spill] sm:$0xff] }
  0x96   : > { %4034 = vmatprep.mubr.msk.bf16.mxu0 %vm756_vm3, %v5152_v56  ;;  %4397 = vmatprep.subr.msk.bf16.mxu0 %vm805_vm0, %v3584_v60  ;;  %v2540_v60 = vshrl.u32 %v5314_v24, 16 }
  0x9c   : > { %3881 = vmatmul.mubr.msk.bf16.gmra.mrb[20].mxu1 %vm756_vm3, %v5136_v49  ;;  %4035 = vmatmul.mubr.msk.bf16.gmra.mrb[4].mxu0 %vm756_vm3, %v5188_v53 }
  0x9d   : > { %3884 = vmatprep.mubr.msk.bf16.mxu1 %vm756_vm3, %v5140_v54  ;;  %4038 = vmatprep.mubr.msk.bf16.mxu0 %vm756_vm3, %v5194_v8 }
  0xa4   : > { %3885 = vmatmul.mubr.msk.bf16.gmra.mrb[24].mxu1 %vm756_vm3, %v5144_v36  ;;  %4039 = vmatmul.mubr.msk.bf16.gmra.mrb[8].mxu0 %vm756_vm3, %v5217_v40 }
  0xa5   : > { %3888 = vmatprep.mubr.msk.bf16.mxu1 %vm756_vm3, %v5148_v45  ;;  %4042 = vmatprep.mubr.msk.bf16.mxu0 %vm756_vm3, %v5113_v22 }
  0xac   : > { %3889 = vmatmul.mubr.msk.bf16.gmra.mrb[28].mxu1 %vm756_vm3, %v5158_v29  ;;  %4043 = vmatmul.mubr.msk.bf16.gmra.mrb[12].mxu0 %vm756_vm3, %v5123_v57 }
  0xad   : > { %3894 = vmatprep.mubr.msk.bf16.mxu1 %vm756_vm3, %v3460_v59  ;;  %4046 = vmatprep.mubr.msk.bf16.mxu0 %vm756_vm3, %v5132_v5 }
  0xb4   : > { %3895 = vmatmul.mubr.msk.bf16.vlgmr.msra.gmra.mrb[0].mxu1 %vm756_vm3, %v5704_v48  ;;  %4047 = vmatmul.mubr.msk.bf16.gmra.mrb[16].mxu0 %vm756_vm3, %v5136_v49 }
  0xb5   : > { %3927 = vmatpush3.bf16.msra.mxu1 %v1698_v35  ;;  %3898 = vmatprep.mubr.msk.bf16.mxu1 %vm756_vm3, %v5705_v52  ;;  %v2559_v35 = vshll.u32 %v317_v55, 16 }
  0xb6   : > { %4050 = vmatprep.mubr.msk.bf16.mxu0 %vm756_vm3, %v5140_v54  ;;  %4393 = vmatprep.subr.msk.bf16.mxu1 %vm805_vm0, %v4444_v2 }
  0xbc   : > { %3899 = vmatmul.mubr.msk.bf16.gmra.mrb[4].mxu1 %vm756_vm3, %v5706_v3  ;;  %4051 = vmatmul.mubr.msk.bf16.gmra.mrb[20].mxu0 %vm756_vm3, %v5144_v36 }
  0xbd   : > { %3902 = vmatprep.mubr.msk.bf16.mxu1 %vm756_vm3, %v5707_v4  ;;  %4054 = vmatprep.mubr.msk.bf16.mxu0 %vm756_vm3, %v5148_v45 }
  0xc4   : > { %3903 = vmatmul.mubr.msk.bf16.gmra.mrb[8].mxu1 %vm756_vm3, %v5708_v21  ;;  %4055 = vmatmul.mubr.msk.bf16.gmra.mrb[24].mxu0 %vm756_vm3, %v5158_v29 }
  0xc5   : > { %3906 = vmatprep.mubr.msk.bf16.mxu1 %vm756_vm3, %v5709_v13  ;;  %4058 = vmatprep.mubr.msk.bf16.mxu0 %vm756_vm3, %v5303_v11 }
  0xcc   : > { %3907 = vmatmul.mubr.msk.bf16.gmra.mrb[12].mxu1 %vm756_vm3, %v5018_v37  ;;  %4059 = vmatmul.mubr.msk.bf16.gmra.mrb[28].mxu0 %vm756_vm3, %v3548_v61  ;;  %v2561_v61 = vrot.slane %v2559_v35, 5 }
  0xcd   : > { %3910 = vmatprep.mubr.msk.bf16.mxu1 %vm756_vm3, %v5049_v41  ;;  %4064 = vmatprep.mubr.msk.bf16.mxu0 %vm756_vm3, %v5710_v17 }
  0xd4   : > { %3911 = vmatmul.mubr.msk.bf16.gmra.mrb[16].mxu1 %vm756_vm3, %v5053_v50  ;;  %4065 = vmatmul.mubr.msk.bf16.vlgmr.msra.gmra.mrb[0].mxu0 %vm756_vm3, %v5711_v51 }
  0xd5   : > { %4097 = vmatpush3.bf16.msra.mxu0 %v2784_v10  ;;  %3914 = vmatprep.mubr.msk.bf16.mxu1 %vm756_vm3, %v5075_v20 }
  0xd6   : > { %4068 = vmatprep.mubr.msk.bf16.mxu0 %vm756_vm3, %v5712_v33 }
  0xdc   : > { %3915 = vmatmul.mubr.msk.bf16.gmra.mrb[20].mxu1 %vm756_vm3, %v5086_v0  ;;  %4069 = vmatmul.mubr.msk.bf16.gmra.mrb[4].mxu0 %vm756_vm3, %v5713_v39 }
  0xdd   : > { %3918 = vmatprep.mubr.msk.bf16.mxu1 %vm756_vm3, %v5127_v62  ;;  %4072 = vmatprep.mubr.msk.bf16.mxu0 %vm756_vm3, %v5714_v58 }
  0xe4   : > { %3919 = vmatmul.mubr.msk.bf16.gmra.mrb[24].mxu1 %vm756_vm3, %v5154_v31  ;;  %4073 = vmatmul.mubr.msk.bf16.gmra.mrb[8].mxu0 %vm756_vm3, %v5715_v42 }
  0xe5   : > { %3922 = vmatprep.mubr.msk.bf16.mxu1 %vm756_vm3, %v5190_v44  ;;  %4076 = vmatprep.mubr.msk.bf16.mxu0 %vm756_vm3, %v5716_v15 }
  0xec   : > { %3923 = vmatmul.mubr.msk.bf16.gmra.mrb[28].mxu1 %vm756_vm3, %v5200_v1  ;;  %4077 = vmatmul.mubr.msk.bf16.gmra.mrb[12].mxu0 %vm756_vm3, %v5717_v27 }
  0xed   : > { %3928 = vmatprep.mubr.msk.bf16.mxu1 %vm756_vm3, %v4592_v38  ;;  %4080 = vmatprep.mubr.msk.bf16.mxu0 %vm756_vm3, %v5718_v6  ;;  %v2549_v38 = vshll.u32 %v5317_v9, 16 }
  0xef   : > { %v2551_v18 = vrot.slane %v2549_v38, 5 }
  0xf1   : > { %v2556_v59 = vor.u32 %v2555_v43, %v2551_v18 }
  0xf3   : > { %v2557_v2 = vrot.slane %v2556_v59, 4 }
  0xf4   : > { %3929 = vmatmul.mubr.msk.bf16.vlgmr.msra.gmra.mrb[0].mxu1 %vm756_vm3, %v5081_v47  ;;  %4081 = vmatmul.mubr.msk.bf16.gmra.mrb[16].mxu0 %vm756_vm3, %v5719_v7  ;;  %v2542_v47 = vrot.slane %v2540_v60, 4 }
  0xf5   : > { %4131 = vmatpush3.bf16.msra.mxu1 %v5720_v25  ;;  %3932 = vmatprep.mubr.msk.bf16.mxu1 %vm756_vm3, %v5107_v23 }
  0xf6   : > { %4084 = vmatprep.mubr.msk.bf16.mxu0 %vm756_vm3, %v5721_v46  ;;  %v2546_v23 = vor.u32 %v2545_v32, %v2542_v47 }
  0xf8   : > { %v2547_v48 = vrot.slane %v2546_v23, 4 }
  0xfc   : > { %3933 = vmatmul.mubr.msk.bf16.gmra.mrb[4].mxu1 %vm756_vm3, %v5152_v56  ;;  %4085 = vmatmul.mubr.msk.bf16.gmra.mrb[20].mxu0 %vm756_vm3, %v5722_v12  ;;  %v2552_v56 = vsel %vm4586_vm4, %v2547_v48, %v2551_v18 }
  0xfd   : > { %3936 = vmatprep.mubr.msk.bf16.mxu1 %vm756_vm3, %v5188_v53  ;;  %4088 = vmatprep.mubr.msk.bf16.mxu0 %vm756_vm3, %v5020_v30  ;;  %v2562_v53 = vsel %vm4586_vm4, %v2557_v2, %v2561_v61 }
  0xfe   : > { %v3566_v17 = vcombine.low %v2552_v56, %v2562_v53 }
 0x104   : > { %3937 = vmatmul.mubr.msk.bf16.gmra.mrb[8].mxu1 %vm756_vm3, %v5194_v8  ;;  %4089 = vmatmul.mubr.msk.bf16.gmra.mrb[24].mxu0 %vm756_vm3, %v5047_v63 }
 0x105   : > { %3940 = vmatprep.mubr.msk.bf16.mxu1 %vm756_vm3, %v5217_v40  ;;  %4092 = vmatprep.mubr.msk.bf16.mxu0 %vm756_vm3, %v5225_v16 }
 0x10c   : > { %3941 = vmatmul.mubr.msk.bf16.gmra.mrb[12].mxu1 %vm756_vm3, %v5113_v22  ;;  %4093 = vmatmul.mubr.msk.bf16.gmra.mrb[28].mxu0 %vm756_vm3, %v3566_v17 }
 0x10d   : > { %3944 = vmatprep.mubr.msk.bf16.mxu1 %vm756_vm3, %v5123_v57  ;;  %4098 = vmatprep.mubr.msk.bf16.mxu0 %vm756_vm3, %v5705_v52 }
 0x114   : > { %3945 = vmatmul.mubr.msk.bf16.gmra.mrb[16].mxu1 %vm756_vm3, %v5132_v5  ;;  %4099 = vmatmul.mubr.msk.bf16.vlgmr.msra.gmra.mrb[0].mxu0 %vm756_vm3, %v5706_v3 }
 0x115   : > { %3948 = vmatprep.mubr.msk.bf16.mxu1 %vm756_vm3, %v5136_v49  ;;  %4102 = vmatprep.mubr.msk.bf16.mxu0 %vm756_vm3, %v5707_v4  ;;  %v5489_v4 = vld [vmem:[%s5644_s3] ss:$0 sm:$0xff] }
 0x11c   : > { %3949 = vmatmul.mubr.msk.bf16.gmra.mrb[20].mxu1 %vm756_vm3, %v5140_v54  ;;  %4103 = vmatmul.mubr.msk.bf16.gmra.mrb[4].mxu0 %vm756_vm3, %v5708_v21 }
 0x11d   : > { %3952 = vmatprep.mubr.msk.bf16.mxu1 %vm756_vm3, %v5144_v36  ;;  %4106 = vmatprep.mubr.msk.bf16.mxu0 %vm756_vm3, %v5709_v13 }
 0x124   : > { %3953 = vmatmul.mubr.msk.bf16.gmra.mrb[24].mxu1 %vm756_vm3, %v5148_v45  ;;  %4107 = vmatmul.mubr.msk.bf16.gmra.mrb[8].mxu0 %vm756_vm3, %v5018_v37  ;;  %v3583_v37 = vrot.slane %v5314_v24, 9 }
 0x125   : > { %3956 = vmatprep.mubr.msk.bf16.mxu1 %vm756_vm3, %v5158_v29  ;;  %4110 = vmatprep.mubr.msk.bf16.mxu0 %vm756_vm3, %v5049_v41  ;;  %v2772_v41 = vrot.slane %v2770_v34, 4 }
 0x12c   : > { %3957 = vmatmul.mubr.msk.bf16.gmra.mrb[28].mxu1 %vm756_vm3, %v5303_v11  ;;  %4111 = vmatmul.mubr.msk.bf16.gmra.mrb[12].mxu0 %vm756_vm3, %v5053_v50  ;;  %v2773_v50 = vrot.slane %v317_v55, 5 }
 0x12d   : > { %3978 = vmatprep.mubr.msk.bf16.mxu1 %vm756_vm3, %v5717_v27  ;;  %4114 = vmatprep.mubr.msk.bf16.mxu0 %vm756_vm3, %v5075_v20  ;;  %v2771_v20 = vsel %vm4767_vm7, %v3583_v37, %v2770_v34 }
 0x134   : > { %3979 = vmatmul.mubr.msk.bf16.vlgmr.msra.gmra.mrb[16].mxu1 %vm756_vm3, %v5718_v6  ;;  %4115 = vmatmul.mubr.msk.bf16.gmra.mrb[16].mxu0 %vm756_vm3, %v5086_v0  ;;  %v2774_v0 = vsel %vm4767_vm7, %v2772_v41, %v2773_v50 }
 0x135   : > { %3982 = vmatprep.mubr.msk.bf16.mxu1 %vm756_vm3, %v5719_v7  ;;  %4118 = vmatprep.mubr.msk.bf16.mxu0 %vm756_vm3, %v5127_v62  ;;  %v3585_v22 = vcombine.low %v2771_v20, %v2774_v0 }
 0x13c   : > { %3983 = vmatmul.mubr.msk.bf16.gmra.mrb[20].mxu1 %vm756_vm3, %v5721_v46  ;;  %4119 = vmatmul.mubr.msk.bf16.gmra.mrb[20].mxu0 %vm756_vm3, %v5154_v31 }
 0x13d   : > { %3986 = vmatprep.mubr.msk.bf16.mxu1 %vm756_vm3, %v5722_v12  ;;  %4122 = vmatprep.mubr.msk.bf16.mxu0 %vm756_vm3, %v5190_v44 }
 0x144   : > { %3987 = vmatmul.mubr.msk.bf16.gmra.mrb[24].mxu1 %vm756_vm3, %v5020_v30  ;;  %4123 = vmatmul.mubr.msk.bf16.gmra.mrb[24].mxu0 %vm756_vm3, %v5200_v1 }
 0x145   : > { %3990 = vmatprep.mubr.msk.bf16.mxu1 %vm756_vm3, %v5047_v63  ;;  %4126 = vmatprep.mubr.msk.bf16.mxu0 %vm756_vm3, %v5219_v19 }
 0x14c   : > { %3991 = vmatmul.mubr.msk.bf16.gmra.mrb[28].mxu1 %vm756_vm3, %v5225_v16  ;;  %4127 = vmatmul.mubr.msk.bf16.gmra.mrb[28].mxu0 %vm756_vm3, %v3585_v22  ;;  %v5484_v16 = vld [vmem:[%s5643_s2] ss:$0 sm:$0xff] }
 0x1c7   : > { %v3930_v30 = vpop.f32.mrb[0].mxu1 }
 0x1c8   : > { %v1734_v57 = vpop.f32.mrb[1].mxu1 }
 0x1c9   : > { %v3931_v62 = vpop.f32.mrb[2].mxu1 }
 0x1ca   : > { %v1737_v5 = vpop.f32.mrb[3].mxu1 }
 0x1cf   : > { %v3934_v63 = vpop.f32.mrb[4].mxu1 }
 0x1d0   : > { %v1750_v49 = vpop.f32.mrb[5].mxu1 }
 0x1d1   : > { %v3935_v54 = vpop.f32.mrb[6].mxu1 }
 0x1d2   : > { %v1753_v36 = vpop.f32.mrb[7].mxu1 }
 0x1d7   : > { %v3938_v45 = vpop.f32.mrb[8].mxu1 }
 0x1d8   : > { %v5467_v31 = vpop.f32.mrb[9].mxu1 }
 0x1d9   : > { %v5469_v29 = vpop.f32.mrb[10].mxu1 }
 0x1da   : > { %v5471_v26 = vpop.f32.mrb[11].mxu1 }
 0x1df   : > { %v5473_v44 = vpop.f32.mrb[12].mxu1 }
 0x1e0   : > { %v5475_v8 = vpop.f32.mrb[13].mxu1 }
 0x1e1   : > { %v5477_v1 = vpop.f32.mrb[14].mxu1 }
 0x1e2   : > { %v5479_v40 = vpop.f32.mrb[15].mxu1 }
 0x1e7   : > { %v4100_v19 = vpop.f32.mrb[0].mxu0 }
 0x1e8   : > { %v4132_v52 = vadd.f32 %v4100_v19, %v3930_v30  ;;  %v2820_v3 = vpop.f32.mrb[1].mxu0 }
 0x1e9   : > { %v4133_v11 = vadd.f32 %v2820_v3, %v1734_v57  ;;  %v4101_v21 = vpop.f32.mrb[2].mxu0 }
 0x1ea   : > { %v2988_v13 = vmul.f32 %v4132_v52, %v5484_v16  ;;  %v4134_v24 = vadd.f32 %v4101_v21, %v3931_v62  ;;  %v2823_v9 = vpop.f32.mrb[3].mxu0 }
 0x1eb   : > { %v2986_v10 = vmul.f32 %v4133_v11, %v5484_v16  ;;  %v4135_v51 = vadd.f32 %v2823_v9, %v1737_v5 }
 0x1ec   : > { %v3027_v33 = vadd.f32 %v5489_v4, %v2988_v13  ;;  %v2989_v39 = vmul.f32 %v4134_v24, %v5484_v16 }
 0x1ed   : > { %v3025_v58 = vadd.f32 %v5489_v4, %v2986_v10  ;;  %v2987_v42 = vmul.f32 %v4135_v51, %v5484_v16 }
 0x1ee   : > { %v3059_v15 = vmax.f32 %v3027_v33, 0.0  ;;  %v3028_v27 = vadd.f32 %v5489_v4, %v2989_v39 }
 0x1ef   : > { %v3057_v6 = vmax.f32 %v3025_v58, 0.0  ;;  %v3026_v7 = vadd.f32 %v5489_v4, %v2987_v42  ;;  %v4104_v60 = vpop.f32.mrb[4].mxu0 }
 0x1f0   : > { %v3641_v14 = vpack.c.bf16 %v3059_v15, %v3059_v15  ;;  %v3060_v28 = vmax.f32 %v3028_v27, 0.0  ;;  %v4136_v25 = vadd.f32 %v4104_v60, %v3934_v63  ;;  %v2836_v38 = vpop.f32.mrb[5].mxu0 }
 0x1f1   : > { %v3639_v46 = vpack.c.bf16 %v3057_v6, %v3057_v6  ;;  %v3058_v47 = vmax.f32 %v3026_v7, 0.0  ;;  %v4137_v32 = vadd.f32 %v2836_v38, %v1750_v49  ;;  %v4105_v18 = vpop.f32.mrb[6].mxu0 }
 0x1f2   : > { %3220 = vst.msk [vmem:[%s5502_s28 + $0x8] sm:$0xf] %vm3217_vm8, %v3641_v14  ;;  %v3642_v43 = vpack.c.bf16 %v3060_v28, %v3060_v28  ;;  %v2992_v55 = vmul.f32 %v4136_v25, %v5484_v16  ;;  %v4138_v12 = vadd.f32 %v4105_v18, %v3935_v54  ;;  %v2839_v23 = vpop.f32.mrb[7].mxu0 }
 0x1f3   : > { %3218 = vst.msk [vmem:[%s5502_s28] sm:$0xf] %vm3217_vm8, %v3639_v46  ;;  %v3640_v59 = vpack.c.bf16 %v3058_v47, %v3058_v47  ;;  %v2990_v35 = vmul.f32 %v4137_v32, %v5484_v16  ;;  %v4139_v48 = vadd.f32 %v2839_v23, %v1753_v36 }
 0x1f4   : > { %3221 = vst.msk [vmem:[%s5502_s28 + $0xc] sm:$0xf] %vm3217_vm8, %v3642_v43  ;;  %v3031_v2 = vadd.f32 %v5489_v4, %v2992_v55  ;;  %v2993_v61 = vmul.f32 %v4138_v12, %v5484_v16 }
 0x1f5   : > { %3219 = vst.msk [vmem:[%s5502_s28 + $0x4] sm:$0xf] %vm3217_vm8, %v3640_v59  ;;  %v3029_v56 = vadd.f32 %v5489_v4, %v2990_v35  ;;  %v2991_v53 = vmul.f32 %v4139_v48, %v5484_v16 }
 0x1f6   : > { %v3063_v17 = vmax.f32 %v3031_v2, 0.0  ;;  %v3032_v34 = vadd.f32 %v5489_v4, %v2993_v61 }
 0x1f7   : > { %v3061_v37 = vmax.f32 %v3029_v56, 0.0  ;;  %v3030_v41 = vadd.f32 %v5489_v4, %v2991_v53  ;;  %v4108_v50 = vpop.f32.mrb[8].mxu0 }
 0x1f8   : > { %v3645_v20 = vpack.c.bf16 %v3063_v17, %v3063_v17  ;;  %v3064_v0 = vmax.f32 %v3032_v34, 0.0  ;;  %v4140_v22 = vadd.f32 %v4108_v50, %v3938_v45  ;;  %v2852_v30 = vpop.f32.mrb[9].mxu0 }
 0x1f9   : > { %v3643_v57 = vpack.c.bf16 %v3061_v37, %v3061_v37  ;;  %v3062_v62 = vmax.f32 %v3030_v41, 0.0  ;;  %v4141_v5 = vadd.f32 %v2852_v30, %v5467_v31  ;;  %v4109_v63 = vpop.f32.mrb[10].mxu0 }
 0x1fa   : > { %3224 = vst.msk [vmem:[%s5502_s28 + $0x18] sm:$0xf] %vm3217_vm8, %v3645_v20  ;;  %v3646_v49 = vpack.c.bf16 %v3064_v0, %v3064_v0  ;;  %v2996_v54 = vmul.f32 %v4140_v22, %v5484_v16  ;;  %v4142_v36 = vadd.f32 %v4109_v63, %v5469_v29  ;;  %v2855_v19 = vpop.f32.mrb[11].mxu0 }
 0x1fb   : > { %3222 = vst.msk [vmem:[%s5502_s28 + $0x10] sm:$0xf] %vm3217_vm8, %v3643_v57  ;;  %v3644_v52 = vpack.c.bf16 %v3062_v62, %v3062_v62  ;;  %v2994_v45 = vmul.f32 %v4141_v5, %v5484_v16  ;;  %v4143_v3 = vadd.f32 %v2855_v19, %v5471_v26 }
 0x1fc   : > { %3225 = vst.msk [vmem:[%s5502_s28 + $0x1c] sm:$0xf] %vm3217_vm8, %v3646_v49  ;;  %v3035_v31 = vadd.f32 %v5489_v4, %v2996_v54  ;;  %v2997_v11 = vmul.f32 %v4142_v36, %v5484_v16 }
 0x1fd   : > { %3223 = vst.msk [vmem:[%s5502_s28 + $0x14] sm:$0xf] %vm3217_vm8, %v3644_v52  ;;  %v3033_v21 = vadd.f32 %v5489_v4, %v2994_v45  ;;  %v2995_v29 = vmul.f32 %v4143_v3, %v5484_v16 }
 0x1fe   : > { %v3067_v13 = vmax.f32 %v3035_v31, 0.0  ;;  %v3036_v24 = vadd.f32 %v5489_v4, %v2997_v11 }
 0x1ff   : > { %v3065_v9 = vmax.f32 %v3033_v21, 0.0  ;;  %v3034_v26 = vadd.f32 %v5489_v4, %v2995_v29  ;;  %v4112_v10 = vpop.f32.mrb[12].mxu0 }
 0x200   : > { %v3649_v51 = vpack.c.bf16 %v3067_v13, %v3067_v13  ;;  %v3068_v33 = vmax.f32 %v3036_v24, 0.0  ;;  %v4144_v39 = vadd.f32 %v4112_v10, %v5473_v44  ;;  %v2868_v58 = vpop.f32.mrb[13].mxu0 }
 0x201   : > { %v3647_v42 = vpack.c.bf16 %v3065_v9, %v3065_v9  ;;  %v3066_v15 = vmax.f32 %v3034_v26, 0.0  ;;  %v4145_v27 = vadd.f32 %v2868_v58, %v5475_v8  ;;  %v4113_v6 = vpop.f32.mrb[14].mxu0 }
 0x202   : > { %3228 = vst.msk [vmem:[%s5502_s28 + $0x28] sm:$0xf] %vm3217_vm8, %v3649_v51  ;;  %v3650_v7 = vpack.c.bf16 %v3068_v33, %v3068_v33  ;;  %v3000_v60 = vmul.f32 %v4144_v39, %v5484_v16  ;;  %v4146_v14 = vadd.f32 %v4113_v6, %v5477_v1  ;;  %v2871_v28 = vpop.f32.mrb[15].mxu0 }
 0x203   : > { %3226 = vst.msk [vmem:[%s5502_s28 + $0x20] sm:$0xf] %vm3217_vm8, %v3647_v42  ;;  %v3648_v25 = vpack.c.bf16 %v3066_v15, %v3066_v15  ;;  %v2998_v44 = vmul.f32 %v4145_v27, %v5484_v16  ;;  %v4147_v38 = vadd.f32 %v2871_v28, %v5479_v40 }
 0x204   : > { %3229 = vst.msk [vmem:[%s5502_s28 + $0x2c] sm:$0xf] %vm3217_vm8, %v3650_v7  ;;  %v3039_v8 = vadd.f32 %v5489_v4, %v3000_v60  ;;  %v3001_v46 = vmul.f32 %v4146_v14, %v5484_v16 }
 0x205   : > { %3227 = vst.msk [vmem:[%s5502_s28 + $0x24] sm:$0xf] %vm3217_vm8, %v3648_v25  ;;  %v3037_v47 = vadd.f32 %v5489_v4, %v2998_v44  ;;  %v2999_v1 = vmul.f32 %v4147_v38, %v5484_v16 }
 0x206   : > { %v3071_v32 = vmax.f32 %v3039_v8, 0.0  ;;  %v3040_v18 = vadd.f32 %v5489_v4, %v3001_v46 }
 0x207   : > { %v3069_v43 = vmax.f32 %v3037_v47, 0.0  ;;  %v3038_v55 = vadd.f32 %v5489_v4, %v2999_v1  ;;  %v3980_v40 = vpop.f32.mrb[16].mxu1  ;;  %v4116_v12 = vpop.f32.mrb[16].mxu0 }
 0x208   : > { %v3653_v23 = vpack.c.bf16 %v3071_v32, %v3071_v32  ;;  %v3072_v59 = vmax.f32 %v3040_v18, 0.0  ;;  %v4148_v35 = vadd.f32 %v4116_v12, %v3980_v40  ;;  %v2026_v48 = vpop.f32.mrb[17].mxu1  ;;  %v2884_v2 = vpop.f32.mrb[17].mxu0 }
 0x209   : > { %v3651_v61 = vpack.c.bf16 %v3069_v43, %v3069_v43  ;;  %v3070_v56 = vmax.f32 %v3038_v55, 0.0  ;;  %v4149_v53 = vadd.f32 %v2884_v2, %v2026_v48  ;;  %v3981_v17 = vpop.f32.mrb[18].mxu1  ;;  %v4117_v34 = vpop.f32.mrb[18].mxu0 }
 0x20a   : > { %3232 = vst.msk [vmem:[%s5502_s28 + $0x38] sm:$0xf] %vm3217_vm8, %v3653_v23  ;;  %v3654_v37 = vpack.c.bf16 %v3072_v59, %v3072_v59  ;;  %v3004_v41 = vmul.f32 %v4148_v35, %v5484_v16  ;;  %v4150_v50 = vadd.f32 %v4117_v34, %v3981_v17  ;;  %v2029_v20 = vpop.f32.mrb[19].mxu1  ;;  %v2887_v0 = vpop.f32.mrb[19].mxu0 }
 0x20b   : > { %3230 = vst.msk [vmem:[%s5502_s28 + $0x30] sm:$0xf] %vm3217_vm8, %v3651_v61  ;;  %v3652_v22 = vpack.c.bf16 %v3070_v56, %v3070_v56  ;;  %v3002_v30 = vmul.f32 %v4149_v53, %v5484_v16  ;;  %v4151_v57 = vadd.f32 %v2887_v0, %v2029_v20 }
 0x20c   : > { %3233 = vst.msk [vmem:[%s5502_s28 + $0x3c] sm:$0xf] %vm3217_vm8, %v3654_v37  ;;  %v3043_v62 = vadd.f32 %v5489_v4, %v3004_v41  ;;  %v3005_v5 = vmul.f32 %v4150_v50, %v5484_v16 }
 0x20d   : > { %3231 = vst.msk [vmem:[%s5502_s28 + $0x34] sm:$0xf] %vm3217_vm8, %v3652_v22  ;;  %v3041_v63 = vadd.f32 %v5489_v4, %v3002_v30  ;;  %v3003_v49 = vmul.f32 %v4151_v57, %v5484_v16 }
 0x20e   : > { %v3075_v54 = vmax.f32 %v3043_v62, 0.0  ;;  %v3044_v36 = vadd.f32 %v5489_v4, %v3005_v5 }
 0x20f   : > { %v3073_v19 = vmax.f32 %v3041_v63, 0.0  ;;  %v3042_v52 = vadd.f32 %v5489_v4, %v3003_v49  ;;  %v3984_v45 = vpop.f32.mrb[20].mxu1  ;;  %v4120_v3 = vpop.f32.mrb[20].mxu0 }
 0x210   : > { %v3657_v31 = vpack.c.bf16 %v3075_v54, %v3075_v54  ;;  %v3076_v11 = vmax.f32 %v3044_v36, 0.0  ;;  %v4152_v21 = vadd.f32 %v4120_v3, %v3984_v45  ;;  %v2042_v29 = vpop.f32.mrb[21].mxu1  ;;  %v2900_v13 = vpop.f32.mrb[21].mxu0 }
 0x211   : > { %v3655_v24 = vpack.c.bf16 %v3073_v19, %v3073_v19  ;;  %v3074_v9 = vmax.f32 %v3042_v52, 0.0  ;;  %v4153_v26 = vadd.f32 %v2900_v13, %v2042_v29  ;;  %v3985_v10 = vpop.f32.mrb[22].mxu1  ;;  %v4121_v51 = vpop.f32.mrb[22].mxu0 }
 0x212   : > { %3236 = vst.msk [vmem:[%s5502_s28 + $0x48] sm:$0xf] %vm3217_vm8, %v3657_v31  ;;  %v3658_v33 = vpack.c.bf16 %v3076_v11, %v3076_v11  ;;  %v3008_v39 = vmul.f32 %v4152_v21, %v5484_v16  ;;  %v4154_v58 = vadd.f32 %v4121_v51, %v3985_v10  ;;  %v2045_v42 = vpop.f32.mrb[23].mxu1  ;;  %v2903_v15 = vpop.f32.mrb[23].mxu0 }
 0x213   : > { %3234 = vst.msk [vmem:[%s5502_s28 + $0x40] sm:$0xf] %vm3217_vm8, %v3655_v24  ;;  %v3656_v27 = vpack.c.bf16 %v3074_v9, %v3074_v9  ;;  %v3006_v6 = vmul.f32 %v4153_v26, %v5484_v16  ;;  %v4155_v7 = vadd.f32 %v2903_v15, %v2045_v42 }
 0x214   : > { %3237 = vst.msk [vmem:[%s5502_s28 + $0x4c] sm:$0xf] %vm3217_vm8, %v3658_v33  ;;  %v3047_v60 = vadd.f32 %v5489_v4, %v3008_v39  ;;  %v3009_v14 = vmul.f32 %v4154_v58, %v5484_v16 }
 0x215   : > { %3235 = vst.msk [vmem:[%s5502_s28 + $0x44] sm:$0xf] %vm3217_vm8, %v3656_v27  ;;  %v3045_v28 = vadd.f32 %v5489_v4, %v3006_v6  ;;  %v3007_v25 = vmul.f32 %v4155_v7, %v5484_v16 }
 0x216   : > { %v3079_v44 = vmax.f32 %v3047_v60, 0.0  ;;  %v3048_v38 = vadd.f32 %v5489_v4, %v3009_v14 }
 0x217   : > { %v3077_v8 = vmax.f32 %v3045_v28, 0.0  ;;  %v3046_v46 = vadd.f32 %v5489_v4, %v3007_v25  ;;  %v3988_v47 = vpop.f32.mrb[24].mxu1  ;;  %v4124_v1 = vpop.f32.mrb[24].mxu0 }
 0x218   : > { %v3661_v32 = vpack.c.bf16 %v3079_v44, %v3079_v44  ;;  %v3080_v18 = vmax.f32 %v3048_v38, 0.0  ;;  %v4156_v43 = vadd.f32 %v4124_v1, %v3988_v47  ;;  %v2058_v55 = vpop.f32.mrb[25].mxu1  ;;  %v2916_v40 = vpop.f32.mrb[25].mxu0 }
 0x219   : > { %v3659_v12 = vpack.c.bf16 %v3077_v8, %v3077_v8  ;;  %v3078_v23 = vmax.f32 %v3046_v46, 0.0  ;;  %v4157_v59 = vadd.f32 %v2916_v40, %v2058_v55  ;;  %v3989_v35 = vpop.f32.mrb[26].mxu1  ;;  %v4125_v48 = vpop.f32.mrb[26].mxu0 }
 0x21a   : > { %3240 = vst.msk [vmem:[%s5502_s28 + $0x58] sm:$0xf] %vm3217_vm8, %v3661_v32  ;;  %v3662_v2 = vpack.c.bf16 %v3080_v18, %v3080_v18  ;;  %v3012_v61 = vmul.f32 %v4156_v43, %v5484_v16  ;;  %v4158_v56 = vadd.f32 %v4125_v48, %v3989_v35  ;;  %v2061_v53 = vpop.f32.mrb[27].mxu1  ;;  %v2919_v17 = vpop.f32.mrb[27].mxu0 }
 0x21b   : > { %3238 = vst.msk [vmem:[%s5502_s28 + $0x50] sm:$0xf] %vm3217_vm8, %v3659_v12  ;;  %v3660_v34 = vpack.c.bf16 %v3078_v23, %v3078_v23  ;;  %v3010_v37 = vmul.f32 %v4157_v59, %v5484_v16  ;;  %v4159_v41 = vadd.f32 %v2919_v17, %v2061_v53 }
 0x21c   : > { %3241 = vst.msk [vmem:[%s5502_s28 + $0x5c] sm:$0xf] %vm3217_vm8, %v3662_v2  ;;  %v3051_v50 = vadd.f32 %v5489_v4, %v3012_v61  ;;  %v3013_v20 = vmul.f32 %v4158_v56, %v5484_v16 }
 0x21d   : > { %3239 = vst.msk [vmem:[%s5502_s28 + $0x54] sm:$0xf] %vm3217_vm8, %v3660_v34  ;;  %v3049_v0 = vadd.f32 %v5489_v4, %v3010_v37  ;;  %v3011_v22 = vmul.f32 %v4159_v41, %v5484_v16 }
 0x21e   : > { %v3083_v30 = vmax.f32 %v3051_v50, 0.0  ;;  %v3052_v57 = vadd.f32 %v5489_v4, %v3013_v20 }
 0x21f   : > { %v3081_v62 = vmax.f32 %v3049_v0, 0.0  ;;  %v3050_v5 = vadd.f32 %v5489_v4, %v3011_v22  ;;  %v3992_v63 = vpop.f32.mrb[28].mxu1  ;;  %v4128_v49 = vpop.f32.mrb[28].mxu0 }
 0x220   : > { %v3665_v54 = vpack.c.bf16 %v3083_v30, %v3083_v30  ;;  %v3084_v36 = vmax.f32 %v3052_v57, 0.0  ;;  %v4160_v19 = vadd.f32 %v4128_v49, %v3992_v63  ;;  %v2074_v52 = vpop.f32.mrb[29].mxu1  ;;  %v2932_v45 = vpop.f32.mrb[29].mxu0 }
 0x221   : > { %v3663_v3 = vpack.c.bf16 %v3081_v62, %v3081_v62  ;;  %v3082_v31 = vmax.f32 %v3050_v5, 0.0  ;;  %v4161_v11 = vadd.f32 %v2932_v45, %v2074_v52  ;;  %v3993_v21 = vpop.f32.mrb[30].mxu1  ;;  %v4129_v29 = vpop.f32.mrb[30].mxu0 }
 0x222   : > { %3244 = vst.msk [vmem:[%s5502_s28 + $0x68] sm:$0xf] %vm3217_vm8, %v3665_v54  ;;  %v3666_v13 = vpack.c.bf16 %v3084_v36, %v3084_v36  ;;  %v3016_v24 = vmul.f32 %v4160_v19, %v5484_v16  ;;  %v4162_v9 = vadd.f32 %v4129_v29, %v3993_v21  ;;  %v2077_v26 = vpop.f32.mrb[31].mxu1  ;;  %v2935_v10 = vpop.f32.mrb[31].mxu0 }
 0x223   : > { %3242 = vst.msk [vmem:[%s5502_s28 + $0x60] sm:$0xf] %vm3217_vm8, %v3663_v3  ;;  %v3664_v51 = vpack.c.bf16 %v3082_v31, %v3082_v31  ;;  %v3014_v33 = vmul.f32 %v4161_v11, %v5484_v16  ;;  %v4163_v39 = vadd.f32 %v2935_v10, %v2077_v26 }
 0x224   : > { %3245 = vst.msk [vmem:[%s5502_s28 + $0x6c] sm:$0xf] %vm3217_vm8, %v3666_v13  ;;  %v3055_v58 = vadd.f32 %v5489_v4, %v3016_v24  ;;  %v3017_v42 = vmul.f32 %v4162_v9, %v5484_v16 }
 0x225   : > { %3243 = vst.msk [vmem:[%s5502_s28 + $0x64] sm:$0xf] %vm3217_vm8, %v3664_v51  ;;  %v3053_v15 = vadd.f32 %v5489_v4, %v3014_v33  ;;  %v3015_v27 = vmul.f32 %v4163_v39, %v5484_v16 }
 0x226   : > { %v3087_v6 = vmax.f32 %v3055_v58, 0.0  ;;  %v3056_v7 = vadd.f32 %v5489_v4, %v3017_v42 }
 0x227   : > { %v3085_v60 = vmax.f32 %v3053_v15, 0.0  ;;  %v3054_v14 = vadd.f32 %v5489_v4, %v3015_v27 }
 0x228   : > { %v3669_v28 = vpack.c.bf16 %v3087_v6, %v3087_v6  ;;  %v3088_v25 = vmax.f32 %v3056_v7, 0.0 }
 0x229   : > { %v3667_v44 = vpack.c.bf16 %v3085_v60, %v3085_v60  ;;  %v3086_v38 = vmax.f32 %v3054_v14, 0.0 }
 0x22a   : > { %3248 = vst.msk [vmem:[%s5502_s28 + $0x78] sm:$0xf] %vm3217_vm8, %v3669_v28  ;;  %v3670_v8 = vpack.c.bf16 %v3088_v25, %v3088_v25 }
 0x22b   : > { %3246 = vst.msk [vmem:[%s5502_s28 + $0x70] sm:$0xf] %vm3217_vm8, %v3667_v44  ;;  %v3668_v46 = vpack.c.bf16 %v3086_v38, %v3086_v38 }
 0x22c   : > { %3249 = vst.msk [vmem:[%s5502_s28 + $0x7c] sm:$0xf] %vm3217_vm8, %v3670_v8 }
 0x22d   : > { %3247 = vst.msk [vmem:[%s5502_s28 + $0x74] sm:$0xf] %vm3217_vm8, %v3668_v46 }
 0x22e PF: > { %s14_s17 = sadd.s32 1, %s4467_s17   ;;  %s5723_s15 = smov %s4463_s16 }
 0x22f   : > { %p11_p5 = scmp.ge.s32.totalorder %s14_s17, 4   ;;  %s5724_s16 = smov %s5726_s18 }
 0x231   :  { %13 = sbr.rel (!%p11_p5) target bundleno = 2 (0x2), region = 83 }

</bundles_post_ra>
